<compile_context>
chip_gen: v7x
topology: tpu7x:2x2x1
jax: 0.10.0
libtpu: 0.0.40
codegen_flags: <defaults>
</compile_context>

<pallas_src>
import functools

import jax
import jax.numpy as jnp
from jax.experimental import pallas as pl
from jax.experimental.pallas import tpu as pltpu


_LN_EPS = 1e-6                       # timm ViT LayerNorm eps
_VMEM_LIMIT = 32 * 1024 * 1024       # safe scoped limit on v5e / v6e / v7x


def _layernorm_f32(x, g, b, eps):
    """LayerNorm over last axis, f32 math, biased variance (matches torch LN)."""
    mu = jnp.mean(x, axis=-1, keepdims=True)
    xc = x - mu
    var = jnp.mean(xc * xc, axis=-1, keepdims=True)
    return (xc * jax.lax.rsqrt(var + eps)) * g + b


def _erf_f32(x):
    """Abramowitz & Stegun 7.1.26 erf approximation, |err| <= 1.5e-7.

    Built only from exp / mul / add / where so it is guaranteed to lower in Mosaic
    (avoids lax.erf_p, which jax.nn.gelu(approximate=False) would emit).
    """
    a1, a2, a3, a4, a5 = 0.254829592, -0.284496736, 1.421413741, -1.453152027, 1.061405429
    p = 0.3275911
    z = jnp.abs(x)
    t = 1.0 / (1.0 + p * z)
    poly = ((((a5 * t + a4) * t + a3) * t + a2) * t + a1) * t
    e = 1.0 - poly * jnp.exp(-z * z)
    return jnp.where(x >= 0, e, -e)


def _gelu_exact_f32(x):
    """nn.GELU() (exact erf form), f32."""
    return 0.5 * x * (1.0 + _erf_f32(x * 0.7071067811865476))


# ----------------------------- Pallas kernels -----------------------------

def _patch_embed_kernel(xp_ref, w_ref, b_ref, o_ref):
    # per-batch: (N, C*P*P) @ (C*P*P, D) + b   (bf16 MXU operands, f32 accumulate)
    y = jnp.dot(xp_ref[0].astype(jnp.bfloat16), w_ref[...],
                preferred_element_type=jnp.float32) + b_ref[...]
    o_ref[0] = y.astype(o_ref.dtype)


def _encoder_block_kernel(tok_ref,
                          ln1g_ref, ln1b_ref, qkvw_ref, qkvb_ref, pw_ref, pb_ref,
                          ln2g_ref, ln2b_ref, w1_ref, b1_ref, w2_ref, b2_ref,
                          o_ref, *, heads, scale, eps):
    """One full transformer encoder block (attention + MLP) for one batch element."""
    x = tok_ref[0]                                           # (S, D) f32
    S, D = x.shape
    hd = D // heads

    # ---------------- attention half ----------------
    h = _layernorm_f32(x, ln1g_ref[...], ln1b_ref[...], eps)

    qkv = jnp.dot(h.astype(jnp.bfloat16), qkvw_ref[...],
                  preferred_element_type=jnp.float32) + qkvb_ref[...]   # (S, 3D) f32

    # fold 1/sqrt(hd) into q (S, D) instead of scaling the (S, S) score matrices
    q_all = (qkv[:, 0 * D:1 * D] * scale).astype(jnp.bfloat16)
    k_all = qkv[:, 1 * D:2 * D].astype(jnp.bfloat16)
    v_all = qkv[:, 2 * D:3 * D].astype(jnp.bfloat16)

    acc = jnp.zeros((S, D), dtype=jnp.float32)
    for hidx in range(heads):                                # static unroll over heads
        sl = slice(hidx * hd, (hidx + 1) * hd)
        qh, kh, vh = q_all[:, sl], k_all[:, sl], v_all[:, sl]            # (S, hd)
        # q @ k^T via dot_general on the last dims (no explicit transpose)
        s = jax.lax.dot_general(qh, kh, (((1,), (1,)), ((), ())),
                                preferred_element_type=jnp.float32)      # (S, S) f32
        m = jnp.max(s, axis=-1, keepdims=True)
        p = jnp.exp(s - m)
        p = p * pl.reciprocal(jnp.sum(p, axis=-1, keepdims=True), approx=True)
        ah = jnp.dot(p.astype(jnp.bfloat16), vh,
                     preferred_element_type=jnp.float32)                 # (S, hd)
        # fold this head's rows of the output projection into the accumulator
        acc = acc + jnp.dot(ah.astype(jnp.bfloat16), pw_ref[sl, :],
                            preferred_element_type=jnp.float32)          # (S, D)

    x = x + acc + pb_ref[...]                                # residual 1 (f32)

    # ---------------- MLP half ----------------
    h2 = _layernorm_f32(x, ln2g_ref[...], ln2b_ref[...], eps)
    h2 = jnp.dot(h2.astype(jnp.bfloat16), w1_ref[...],
                 preferred_element_type=jnp.float32) + b1_ref[...]       # (S, F) f32
    h2 = _gelu_exact_f32(h2)
    h2 = jnp.dot(h2.astype(jnp.bfloat16), w2_ref[...],
                 preferred_element_type=jnp.float32) + b2_ref[...]       # (S, D) f32

    o_ref[0] = (x + h2).astype(o_ref.dtype)                  # residual 2


def _ln_head_kernel(x_ref, g_ref, b_ref, w_ref, hb_ref, o_ref, *, eps):
    # final LayerNorm on the cls tokens + (Dropout(0.5)=identity) + Linear head
    x = x_ref[...]                                           # (B, D) f32
    h = _layernorm_f32(x, g_ref[...], b_ref[...], eps)
    o_ref[...] = (jnp.dot(h.astype(jnp.bfloat16), w_ref[...],
                          preferred_element_type=jnp.float32) + hb_ref[...]
                  ).astype(o_ref.dtype)


# ----------------------------- kernel wrappers -----------------------------

def patch_embed(xp, w, b):
    """xp: (B, N, C*P*P) f32, w: (C*P*P, D) bf16 -> (B, N, D) f32."""
    B, N, K = xp.shape
    D = w.shape[1]
    return pl.pallas_call(
        _patch_embed_kernel,
        grid=(B,),
        out_shape=jax.ShapeDtypeStruct((B, N, D), jnp.float32),
        in_specs=[
            pl.BlockSpec((1, N, K), lambda i: (i, 0, 0)),
            pl.BlockSpec((K, D), lambda i: (0, 0)),
            pl.BlockSpec((1, D), lambda i: (0, 0)),
        ],
        out_specs=pl.BlockSpec((1, N, D), lambda i: (i, 0, 0)),
        compiler_params=pltpu.CompilerParams(
            dimension_semantics=("parallel",), vmem_limit_bytes=_VMEM_LIMIT),
    )(xp, w, b.reshape(1, D))


def encoder_block(tok, blk, *, heads):
    """tok: (B, S, D) f32 -> full fused transformer block (attention + MLP)."""
    B, S, D = tok.shape
    F = blk["fc1_w"].shape[1]
    hd = D // heads
    scale = 1.0 / float(hd) ** 0.5
    cost = pl.CostEstimate(
        flops=B * (2 * S * D * 3 * D          # qkv
                   + 4 * heads * S * S * hd   # qk^T + pv
                   + 2 * S * D * D            # out proj
                   + 4 * S * D * F),          # fc1 + fc2
        transcendentals=B * (heads * S * S + S * F),
        bytes_accessed=(8 * B * S * D
                        + 2 * (3 * D * D + D * D + 2 * D * F)
                        + 4 * (8 * D + F)),
    )
    return pl.pallas_call(
        functools.partial(_encoder_block_kernel, heads=heads, scale=scale,
                          eps=_LN_EPS),
        grid=(B,),
        out_shape=jax.ShapeDtypeStruct((B, S, D), jnp.float32),
        in_specs=[
            pl.BlockSpec((1, S, D), lambda i: (i, 0, 0)),        # tokens
            pl.BlockSpec((1, D), lambda i: (0, 0)),              # ln1_g
            pl.BlockSpec((1, D), lambda i: (0, 0)),              # ln1_b
            pl.BlockSpec((D, 3 * D), lambda i: (0, 0)),          # qkv_w
            pl.BlockSpec((1, 3 * D), lambda i: (0, 0)),          # qkv_b
            pl.BlockSpec((D, D), lambda i: (0, 0)),              # proj_w
            pl.BlockSpec((1, D), lambda i: (0, 0)),              # proj_b
            pl.BlockSpec((1, D), lambda i: (0, 0)),              # ln2_g
            pl.BlockSpec((1, D), lambda i: (0, 0)),              # ln2_b
            pl.BlockSpec((D, F), lambda i: (0, 0)),              # fc1_w
            pl.BlockSpec((1, F), lambda i: (0, 0)),              # fc1_b
            pl.BlockSpec((F, D), lambda i: (0, 0)),              # fc2_w
            pl.BlockSpec((1, D), lambda i: (0, 0)),              # fc2_b
        ],
        out_specs=pl.BlockSpec((1, S, D), lambda i: (i, 0, 0)),
        compiler_params=pltpu.CompilerParams(
            dimension_semantics=("parallel",), vmem_limit_bytes=_VMEM_LIMIT),
        cost_estimate=cost,
    )(tok,
      blk["ln1_g"].reshape(1, D), blk["ln1_b"].reshape(1, D),
      blk["qkv_w"], blk["qkv_b"].reshape(1, 3 * D),
      blk["proj_w"], blk["proj_b"].reshape(1, D),
      blk["ln2_g"].reshape(1, D), blk["ln2_b"].reshape(1, D),
      blk["fc1_w"], blk["fc1_b"].reshape(1, F),
      blk["fc2_w"], blk["fc2_b"].reshape(1, D))


def ln_head(cls_tok, g, b, w, hb):
    """cls_tok: (B, D) f32, w: (D, Cpad) bf16 -> (B, Cpad) f32 logits (lane-dense)."""
    B, D = cls_tok.shape
    Cpad = w.shape[1]
    return pl.pallas_call(
        functools.partial(_ln_head_kernel, eps=_LN_EPS),
        grid=(1,),
        out_shape=jax.ShapeDtypeStruct((B, Cpad), jnp.float32),
        in_specs=[
            pl.BlockSpec((B, D), lambda i: (0, 0)),
            pl.BlockSpec((1, D), lambda i: (0, 0)),
            pl.BlockSpec((1, D), lambda i: (0, 0)),
            pl.BlockSpec((D, Cpad), lambda i: (0, 0)),
            pl.BlockSpec((1, Cpad), lambda i: (0, 0)),
        ],
        out_specs=pl.BlockSpec((B, Cpad), lambda i: (0, 0)),
        compiler_params=pltpu.CompilerParams(
            dimension_semantics=("arbitrary",), vmem_limit_bytes=_VMEM_LIMIT),
    )(cls_tok, g.reshape(1, D), b.reshape(1, D), w, hb.reshape(1, Cpad))


# --------------------------- parameter creation ----------------------------

def init_vit_params(key, *, in_chans, patch, dim, depth, heads, mlp_hidden,
                    num_patches, num_classes):
    """Synthetic ViT weights (shapes mirror timm vit_base, scaled down).

    Matmul weights are stored bf16 (MXU operands); biases / LN params / embeddings
    stay f32. The head weight is zero-padded to a 128-multiple of classes so the
    kernel's output lane width is dense; the wrapper slices back to num_classes.
    """
    def nrm(k, shape, std=0.02, dtype=jnp.float32):
        return (std * jax.random.normal(k, shape, dtype=jnp.float32)).astype(dtype)

    keys = iter(jax.random.split(key, 8 + depth * 8))
    cpad = ((num_classes + 127) // 128) * 128
    p = {}
    p["patch_w"] = nrm(next(keys), (in_chans * patch * patch, dim), dtype=jnp.bfloat16)
    p["patch_b"] = jnp.zeros((dim,), jnp.float32)
    p["cls_token"] = nrm(next(keys), (1, 1, dim))
    p["pos_embed"] = nrm(next(keys), (1, num_patches + 1, dim))
    p["blocks"] = []
    for _ in range(depth):
        blk = {
            "ln1_g": jnp.ones((dim,), jnp.float32),
            "ln1_b": jnp.zeros((dim,), jnp.float32),
            "qkv_w": nrm(next(keys), (dim, 3 * dim), dtype=jnp.bfloat16),
            "qkv_b": jnp.zeros((3 * dim,), jnp.float32),
            "proj_w": nrm(next(keys), (dim, dim), dtype=jnp.bfloat16),
            "proj_b": jnp.zeros((dim,), jnp.float32),
            "ln2_g": jnp.ones((dim,), jnp.float32),
            "ln2_b": jnp.zeros((dim,), jnp.float32),
            "fc1_w": nrm(next(keys), (dim, mlp_hidden), dtype=jnp.bfloat16),
            "fc1_b": jnp.zeros((mlp_hidden,), jnp.float32),
            "fc2_w": nrm(next(keys), (mlp_hidden, dim), dtype=jnp.bfloat16),
            "fc2_b": jnp.zeros((dim,), jnp.float32),
        }
        p["blocks"].append(blk)
    p["norm_g"] = jnp.ones((dim,), jnp.float32)
    p["norm_b"] = jnp.zeros((dim,), jnp.float32)
    # replaced head: Dropout(0.5) [identity in eval] + Linear(dim, num_classes)
    head_w = nrm(next(keys), (dim, num_classes))
    p["head_w"] = jnp.zeros((dim, cpad), jnp.bfloat16).at[:, :num_classes].set(
        head_w.astype(jnp.bfloat16))
    p["head_b"] = jnp.zeros((cpad,), jnp.float32)
    return p


# ------------------------------- forward pass ------------------------------

def vit_forward(x, params, *, patch, heads, num_classes):
    B, C, H, W = x.shape
    gh, gw = H // patch, W // patch
    N = gh * gw
    D = params["patch_w"].shape[1]

    # --- patch embedding: conv(P, stride=P) == per-patch flatten + matmul ---
    xp = x.reshape(B, C, gh, patch, gw, patch)
    xp = xp.transpose(0, 2, 4, 1, 3, 5).reshape(B, N, C * patch * patch)
    tok = patch_embed(xp, params["patch_w"], params["patch_b"])       # (B, N, D)

    # --- prepend cls token, add positional embedding (tiny plain-JAX glue) ---
    cls = jnp.broadcast_to(params["cls_token"], (B, 1, D))
    tok = jnp.concatenate([cls, tok], axis=1) + params["pos_embed"]   # (B, S, D)

    # --- transformer blocks: one fused pallas_call per block ---
    for blk in params["blocks"]:
        tok = encoder_block(tok, blk, heads=heads)

    # --- final norm on cls token + (dropout=identity) + linear head ---
    cls_out = tok[:, 0]                                               # (B, D)
    logits_padded = ln_head(cls_out, params["norm_g"], params["norm_b"],
                            params["head_w"], params["head_b"])       # (B, Cpad)
    return logits_padded[:, :num_classes]


# ----------------------------------- main -----------------------------------

if __name__ == "__main__":
    # Small-shape stand-in for vit_base_patch16_224 (TPU-layout-friendly dims):
    #   image 3x64x64, patch 16 -> 16 patches (+1 cls = 17 tokens),
    #   embed dim 128, 4 heads (head_dim 32), depth 2, mlp hidden 512, 3 classes.
    B, C, H, W = 2, 3, 64, 64
    PATCH, DIM, DEPTH, HEADS, MLP, NUM_CLASSES = 16, 128, 2, 4, 512, 3
    NUM_PATCHES = (H // PATCH) * (W // PATCH)

    key = jax.random.PRNGKey(0)
    k_x, k_p = jax.random.split(key)
    x = jax.random.normal(k_x, (B, C, H, W), dtype=jnp.float32)
    params = init_vit_params(
        k_p, in_chans=C, patch=PATCH, dim=DIM, depth=DEPTH, heads=HEADS,
        mlp_hidden=MLP, num_patches=NUM_PATCHES, num_classes=NUM_CLASSES)

    fwd = jax.jit(functools.partial(vit_forward, patch=PATCH, heads=HEADS,
                                    num_classes=NUM_CLASSES))
    logits = fwd(x, params)
    jax.block_until_ready(logits)
    assert logits.shape == (B, NUM_CLASSES) and logits.dtype == jnp.float32
    assert bool(jnp.all(jnp.isfinite(logits)))
    print("KERNEL_OK")
</pallas_src>

<mosaic_0001>
module attributes {stable_mosaic.version = 11 : i64} {
  func.func @_patch_embed_kernel(%arg0: i32, %arg1: memref<1x16x768xf32, #tpu.memory_space<vmem>>, %arg2: memref<768x128xbf16, #tpu.memory_space<vmem>>, %arg3: memref<1x128xf32, #tpu.memory_space<vmem>>, %arg4: memref<1x16x128xf32, #tpu.memory_space<vmem>>) attributes {dimension_semantics = [#tpu.dimension_semantics<parallel>], iteration_bounds = array<i64: 2>, scalar_prefetch = 0 : i64, scratch_operands = 0 : i64, tpu.core_type = #tpu.core_type<tc>, window_params = [{transform_indices = @transform_0, window_bounds = array<i64: 1, 16, 768>}, {pipeline_mode = #tpu.pipeline_mode<synchronous>, transform_indices = @transform_1, window_bounds = array<i64: 768, 128>}, {pipeline_mode = #tpu.pipeline_mode<synchronous>, transform_indices = @transform_2, window_bounds = array<i64: 1, 128>}, {transform_indices = @transform_3, window_bounds = array<i64: 1, 16, 128>}]} {
    %c0 = arith.constant 0 : index
    %c0_0 = arith.constant 0 : index
    %c0_1 = arith.constant 0 : index
    %0 = vector.load %arg1[%c0, %c0_0, %c0_1] : memref<1x16x768xf32, #tpu.memory_space<vmem>>, vector<1x16x768xf32>
    %1 = vector.shape_cast %0 : vector<1x16x768xf32> to vector<16x768xf32>
    %2 = arith.truncf %1 : vector<16x768xf32> to vector<16x768xbf16>
    %c0_2 = arith.constant 0 : index
    %c0_3 = arith.constant 0 : index
    %3 = vector.load %arg2[%c0_2, %c0_3] : memref<768x128xbf16, #tpu.memory_space<vmem>>, vector<768x128xbf16>
    %cst = arith.constant dense<0.000000e+00> : vector<16x128xf32>
    %4 = tpu.matmul %2, %3, %cst {dimension_numbers = #tpu.dot_dimension_numbers<[1], [0], [0], [1], [0, 0, 1, 1], [], []>} : vector<16x768xbf16>, vector<768x128xbf16>, vector<16x128xf32> -> vector<16x128xf32>
    %c0_4 = arith.constant 0 : index
    %c0_5 = arith.constant 0 : index
    %5 = vector.load %arg3[%c0_4, %c0_5] : memref<1x128xf32, #tpu.memory_space<vmem>>, vector<1x128xf32>
    %6 = vector.broadcast %5 : vector<1x128xf32> to vector<16x128xf32>
    %7 = arith.addf %4, %6 : vector<16x128xf32>
    %c0_6 = arith.constant 0 : index
    %c0_7 = arith.constant 0 : index
    %c0_8 = arith.constant 0 : index
    %8 = vector.load %arg4[%c0_6, %c0_7, %c0_8] : memref<1x16x128xf32, #tpu.memory_space<vmem>>, vector<1x16x128xf32>
    %9 = vector.shape_cast %8 : vector<1x16x128xf32> to vector<16x128xf32>
    %10 = vector.shape_cast %7 : vector<16x128xf32> to vector<1x16x128xf32>
    tpu.vector_store %arg4[%c0_6, %c0_7, %c0_8], %10 {strides = array<i32>} : memref<1x16x128xf32, #tpu.memory_space<vmem>>, vector<1x16x128xf32>,
    return
  }
  func.func @transform_0(%arg0: i32) -> (i32, i32, i32) {
    %c0_i32 = arith.constant 0 : i32
    %c0_i32_0 = arith.constant 0 : i32
    %c0_i32_1 = arith.constant 0 : i32
    return %arg0, %c0_i32, %c0_i32_0 : i32, i32, i32
  }
  func.func @transform_1(%arg0: i32) -> (i32, i32) {
    %c0_i32 = arith.constant 0 : i32
    %c0_i32_0 = arith.constant 0 : i32
    %c0_i32_1 = arith.constant 0 : i32
    return %c0_i32, %c0_i32_0 : i32, i32
  }
  func.func @transform_2(%arg0: i32) -> (i32, i32) {
    %c0_i32 = arith.constant 0 : i32
    %c0_i32_0 = arith.constant 0 : i32
    %c0_i32_1 = arith.constant 0 : i32
    return %c0_i32, %c0_i32_0 : i32, i32
  }
  func.func @transform_3(%arg0: i32) -> (i32, i32, i32) {
    %c0_i32 = arith.constant 0 : i32
    %c0_i32_0 = arith.constant 0 : i32
    %c0_i32_1 = arith.constant 0 : i32
    return %arg0, %c0_i32, %c0_i32_0 : i32, i32, i32
  }
}

module attributes {stable_mosaic.version = 11 : i64} {
  func.func @_encoder_block_kernel(%arg0: i32, %arg1: memref<1x17x128xf32, #tpu.memory_space<vmem>>, %arg2: memref<1x128xf32, #tpu.memory_space<vmem>>, %arg3: memref<1x128xf32, #tpu.memory_space<vmem>>, %arg4: memref<128x384xbf16, #tpu.memory_space<vmem>>, %arg5: memref<1x384xf32, #tpu.memory_space<vmem>>, %arg6: memref<128x128xbf16, #tpu.memory_space<vmem>>, %arg7: memref<1x128xf32, #tpu.memory_space<vmem>>, %arg8: memref<1x128xf32, #tpu.memory_space<vmem>>, %arg9: memref<1x128xf32, #tpu.memory_space<vmem>>, %arg10: memref<128x512xbf16, #tpu.memory_space<vmem>>, %arg11: memref<1x512xf32, #tpu.memory_space<vmem>>, %arg12: memref<512x128xbf16, #tpu.memory_space<vmem>>, %arg13: memref<1x128xf32, #tpu.memory_space<vmem>>, %arg14: memref<1x17x128xf32, #tpu.memory_space<vmem>>) attributes {dimension_semantics = [#tpu.dimension_semantics<parallel>], iteration_bounds = array<i64: 2>, scalar_prefetch = 0 : i64, scratch_operands = 0 : i64, tpu.core_type = #tpu.core_type<tc>, window_params = [{transform_indices = @transform_0, window_bounds = array<i64: 1, 17, 128>}, {pipeline_mode = #tpu.pipeline_mode<synchronous>, transform_indices = @transform_1, window_bounds = array<i64: 1, 128>}, {pipeline_mode = #tpu.pipeline_mode<synchronous>, transform_indices = @transform_2, window_bounds = array<i64: 1, 128>}, {pipeline_mode = #tpu.pipeline_mode<synchronous>, transform_indices = @transform_3, window_bounds = array<i64: 128, 384>}, {pipeline_mode = #tpu.pipeline_mode<synchronous>, transform_indices = @transform_4, window_bounds = array<i64: 1, 384>}, {pipeline_mode = #tpu.pipeline_mode<synchronous>, transform_indices = @transform_5, window_bounds = array<i64: 128, 128>}, {pipeline_mode = #tpu.pipeline_mode<synchronous>, transform_indices = @transform_6, window_bounds = array<i64: 1, 128>}, {pipeline_mode = #tpu.pipeline_mode<synchronous>, transform_indices = @transform_7, window_bounds = array<i64: 1, 128>}, {pipeline_mode = #tpu.pipeline_mode<synchronous>, transform_indices = @transform_8, window_bounds = array<i64: 1, 128>}, {pipeline_mode = #tpu.pipeline_mode<synchronous>, transform_indices = @transform_9, window_bounds = array<i64: 128, 512>}, {pipeline_mode = #tpu.pipeline_mode<synchronous>, transform_indices = @transform_10, window_bounds = array<i64: 1, 512>}, {pipeline_mode = #tpu.pipeline_mode<synchronous>, transform_indices = @transform_11, window_bounds = array<i64: 512, 128>}, {pipeline_mode = #tpu.pipeline_mode<synchronous>, transform_indices = @transform_12, window_bounds = array<i64: 1, 128>}, {transform_indices = @transform_13, window_bounds = array<i64: 1, 17, 128>}]} {
    %c0 = arith.constant 0 : index
    %c0_0 = arith.constant 0 : index
    %c0_1 = arith.constant 0 : index
    %0 = vector.load %arg1[%c0, %c0_0, %c0_1] : memref<1x17x128xf32, #tpu.memory_space<vmem>>, vector<1x17x128xf32>
    %1 = vector.shape_cast %0 : vector<1x17x128xf32> to vector<17x128xf32>
    %c0_2 = arith.constant 0 : index
    %c0_3 = arith.constant 0 : index
    %2 = vector.load %arg2[%c0_2, %c0_3] : memref<1x128xf32, #tpu.memory_space<vmem>>, vector<1x128xf32>
    %c0_4 = arith.constant 0 : index
    %c0_5 = arith.constant 0 : index
    %3 = vector.load %arg3[%c0_4, %c0_5] : memref<1x128xf32, #tpu.memory_space<vmem>>, vector<1x128xf32>
    %cst = arith.constant dense<0.000000e+00> : vector<17xf32>
    %4 = vector.multi_reduction <add>, %1, %cst [1] : vector<17x128xf32> to vector<17xf32>
    %5 = vector.shape_cast %4 : vector<17xf32> to vector<17x1xf32>
    %cst_6 = arith.constant 1.280000e+02 : f32
    %6 = vector.broadcast %cst_6 : f32 to vector<17x1xf32>
    %7 = arith.divf %5, %6 : vector<17x1xf32>
    %8 = vector.broadcast %7 : vector<17x1xf32> to vector<17x128xf32>
    %9 = arith.subf %1, %8 : vector<17x128xf32>
    %10 = arith.mulf %9, %9 : vector<17x128xf32>
    %cst_7 = arith.constant dense<0.000000e+00> : vector<17xf32>
    %11 = vector.multi_reduction <add>, %10, %cst_7 [1] : vector<17x128xf32> to vector<17xf32>
    %12 = vector.shape_cast %11 : vector<17xf32> to vector<17x1xf32>
    %cst_8 = arith.constant 1.280000e+02 : f32
    %13 = vector.broadcast %cst_8 : f32 to vector<17x1xf32>
    %14 = arith.divf %12, %13 : vector<17x1xf32>
    %cst_9 = arith.constant 9.99999997E-7 : f32
    %15 = vector.broadcast %cst_9 : f32 to vector<17x1xf32>
    %16 = arith.addf %14, %15 : vector<17x1xf32>
    %17 = math.rsqrt %16 : vector<17x1xf32>
    %18 = vector.broadcast %17 : vector<17x1xf32> to vector<17x128xf32>
    %19 = arith.mulf %9, %18 : vector<17x128xf32>
    %20 = vector.broadcast %2 : vector<1x128xf32> to vector<17x128xf32>
    %21 = arith.mulf %19, %20 : vector<17x128xf32>
    %22 = vector.broadcast %3 : vector<1x128xf32> to vector<17x128xf32>
    %23 = arith.addf %21, %22 : vector<17x128xf32>
    %24 = arith.truncf %23 : vector<17x128xf32> to vector<17x128xbf16>
    %c0_10 = arith.constant 0 : index
    %c0_11 = arith.constant 0 : index
    %25 = vector.load %arg4[%c0_10, %c0_11] : memref<128x384xbf16, #tpu.memory_space<vmem>>, vector<128x384xbf16>
    %cst_12 = arith.constant dense<0.000000e+00> : vector<17x384xf32>
    %26 = tpu.matmul %24, %25, %cst_12 {dimension_numbers = #tpu.dot_dimension_numbers<[1], [0], [0], [1], [0, 0, 1, 1], [], []>} : vector<17x128xbf16>, vector<128x384xbf16>, vector<17x384xf32> -> vector<17x384xf32>
    %c0_13 = arith.constant 0 : index
    %c0_14 = arith.constant 0 : index
    %27 = vector.load %arg5[%c0_13, %c0_14] : memref<1x384xf32, #tpu.memory_space<vmem>>, vector<1x384xf32>
    %28 = vector.broadcast %27 : vector<1x384xf32> to vector<17x384xf32>
    %29 = arith.addf %26, %28 : vector<17x384xf32>
    %30 = vector.extract_strided_slice %29 {offsets = [0, 0], sizes = [17, 128], strides = [1, 1]} : vector<17x384xf32> to vector<17x128xf32>
    %cst_15 = arith.constant 0.176776692 : f32
    %31 = vector.broadcast %cst_15 : f32 to vector<17x128xf32>
    %32 = arith.mulf %30, %31 : vector<17x128xf32>
    %33 = arith.truncf %32 : vector<17x128xf32> to vector<17x128xbf16>
    %34 = vector.extract_strided_slice %29 {offsets = [0, 128], sizes = [17, 128], strides = [1, 1]} : vector<17x384xf32> to vector<17x128xf32>
    %35 = arith.truncf %34 : vector<17x128xf32> to vector<17x128xbf16>
    %36 = vector.extract_strided_slice %29 {offsets = [0, 256], sizes = [17, 128], strides = [1, 1]} : vector<17x384xf32> to vector<17x128xf32>
    %37 = arith.truncf %36 : vector<17x128xf32> to vector<17x128xbf16>
    %cst_16 = arith.constant 0.000000e+00 : f32
    %38 = vector.broadcast %cst_16 : f32 to vector<17x128xf32>
    %39 = vector.extract_strided_slice %33 {offsets = [0, 0], sizes = [17, 32], strides = [1, 1]} : vector<17x128xbf16> to vector<17x32xbf16>
    %40 = vector.extract_strided_slice %35 {offsets = [0, 0], sizes = [17, 32], strides = [1, 1]} : vector<17x128xbf16> to vector<17x32xbf16>
    %41 = vector.extract_strided_slice %37 {offsets = [0, 0], sizes = [17, 32], strides = [1, 1]} : vector<17x128xbf16> to vector<17x32xbf16>
    %cst_17 = arith.constant dense<0.000000e+00> : vector<17x17xf32>
    %42 = tpu.matmul %39, %40, %cst_17 {dimension_numbers = #tpu.dot_dimension_numbers<[1], [1], [0], [0], [0, 0, 1, 0], [], []>} : vector<17x32xbf16>, vector<17x32xbf16>, vector<17x17xf32> -> vector<17x17xf32>
    %cst_18 = arith.constant dense<0xFF800000> : vector<17xf32>
    %43 = vector.multi_reduction <maximumf>, %42, %cst_18 [1] : vector<17x17xf32> to vector<17xf32>
    %44 = vector.shape_cast %43 : vector<17xf32> to vector<17x1xf32>
    %45 = vector.broadcast %44 : vector<17x1xf32> to vector<17x17xf32>
    %46 = arith.subf %42, %45 : vector<17x17xf32>
    %47 = math.exp %46 : vector<17x17xf32>
    %cst_19 = arith.constant dense<0.000000e+00> : vector<17xf32>
    %48 = vector.multi_reduction <add>, %47, %cst_19 [1] : vector<17x17xf32> to vector<17xf32>
    %49 = vector.shape_cast %48 : vector<17xf32> to vector<17x1xf32>
    %50 = tpu.reciprocal %49 {approx = true} : vector<17x1xf32> -> vector<17x1xf32>
    %51 = vector.broadcast %50 : vector<17x1xf32> to vector<17x17xf32>
    %52 = arith.mulf %47, %51 : vector<17x17xf32>
    %53 = arith.truncf %52 : vector<17x17xf32> to vector<17x17xbf16>
    %cst_20 = arith.constant dense<0.000000e+00> : vector<17x32xf32>
    %54 = tpu.matmul %53, %41, %cst_20 {dimension_numbers = #tpu.dot_dimension_numbers<[1], [0], [0], [1], [0, 0, 1, 1], [], []>} : vector<17x17xbf16>, vector<17x32xbf16>, vector<17x32xf32> -> vector<17x32xf32>
    %55 = arith.truncf %54 : vector<17x32xf32> to vector<17x32xbf16>
    %c0_21 = arith.constant 0 : index
    %c0_22 = arith.constant 0 : index
    %56 = vector.load %arg6[%c0_21, %c0_22] : memref<128x128xbf16, #tpu.memory_space<vmem>>, vector<32x128xbf16>
    %cst_23 = arith.constant dense<0.000000e+00> : vector<17x128xf32>
    %57 = tpu.matmul %55, %56, %cst_23 {dimension_numbers = #tpu.dot_dimension_numbers<[1], [0], [0], [1], [0, 0, 1, 1], [], []>} : vector<17x32xbf16>, vector<32x128xbf16>, vector<17x128xf32> -> vector<17x128xf32>
    %58 = arith.addf %38, %57 : vector<17x128xf32>
    %59 = vector.extract_strided_slice %33 {offsets = [0, 32], sizes = [17, 32], strides = [1, 1]} : vector<17x128xbf16> to vector<17x32xbf16>
    %60 = vector.extract_strided_slice %35 {offsets = [0, 32], sizes = [17, 32], strides = [1, 1]} : vector<17x128xbf16> to vector<17x32xbf16>
    %61 = vector.extract_strided_slice %37 {offsets = [0, 32], sizes = [17, 32], strides = [1, 1]} : vector<17x128xbf16> to vector<17x32xbf16>
    %cst_24 = arith.constant dense<0.000000e+00> : vector<17x17xf32>
    %62 = tpu.matmul %59, %60, %cst_24 {dimension_numbers = #tpu.dot_dimension_numbers<[1], [1], [0], [0], [0, 0, 1, 0], [], []>} : vector<17x32xbf16>, vector<17x32xbf16>, vector<17x17xf32> -> vector<17x17xf32>
    %cst_25 = arith.constant dense<0xFF800000> : vector<17xf32>
    %63 = vector.multi_reduction <maximumf>, %62, %cst_25 [1] : vector<17x17xf32> to vector<17xf32>
    %64 = vector.shape_cast %63 : vector<17xf32> to vector<17x1xf32>
    %65 = vector.broadcast %64 : vector<17x1xf32> to vector<17x17xf32>
    %66 = arith.subf %62, %65 : vector<17x17xf32>
    %67 = math.exp %66 : vector<17x17xf32>
    %cst_26 = arith.constant dense<0.000000e+00> : vector<17xf32>
    %68 = vector.multi_reduction <add>, %67, %cst_26 [1] : vector<17x17xf32> to vector<17xf32>
    %69 = vector.shape_cast %68 : vector<17xf32> to vector<17x1xf32>
    %70 = tpu.reciprocal %69 {approx = true} : vector<17x1xf32> -> vector<17x1xf32>
    %71 = vector.broadcast %70 : vector<17x1xf32> to vector<17x17xf32>
    %72 = arith.mulf %67, %71 : vector<17x17xf32>
    %73 = arith.truncf %72 : vector<17x17xf32> to vector<17x17xbf16>
    %cst_27 = arith.constant dense<0.000000e+00> : vector<17x32xf32>
    %74 = tpu.matmul %73, %61, %cst_27 {dimension_numbers = #tpu.dot_dimension_numbers<[1], [0], [0], [1], [0, 0, 1, 1], [], []>} : vector<17x17xbf16>, vector<17x32xbf16>, vector<17x32xf32> -> vector<17x32xf32>
    %75 = arith.truncf %74 : vector<17x32xf32> to vector<17x32xbf16>
    %c32 = arith.constant 32 : index
    %c0_28 = arith.constant 0 : index
    %76 = vector.load %arg6[%c32, %c0_28] : memref<128x128xbf16, #tpu.memory_space<vmem>>, vector<32x128xbf16>
    %cst_29 = arith.constant dense<0.000000e+00> : vector<17x128xf32>
    %77 = tpu.matmul %75, %76, %cst_29 {dimension_numbers = #tpu.dot_dimension_numbers<[1], [0], [0], [1], [0, 0, 1, 1], [], []>} : vector<17x32xbf16>, vector<32x128xbf16>, vector<17x128xf32> -> vector<17x128xf32>
    %78 = arith.addf %58, %77 : vector<17x128xf32>
    %79 = vector.extract_strided_slice %33 {offsets = [0, 64], sizes = [17, 32], strides = [1, 1]} : vector<17x128xbf16> to vector<17x32xbf16>
    %80 = vector.extract_strided_slice %35 {offsets = [0, 64], sizes = [17, 32], strides = [1, 1]} : vector<17x128xbf16> to vector<17x32xbf16>
    %81 = vector.extract_strided_slice %37 {offsets = [0, 64], sizes = [17, 32], strides = [1, 1]} : vector<17x128xbf16> to vector<17x32xbf16>
    %cst_30 = arith.constant dense<0.000000e+00> : vector<17x17xf32>
    %82 = tpu.matmul %79, %80, %cst_30 {dimension_numbers = #tpu.dot_dimension_numbers<[1], [1], [0], [0], [0, 0, 1, 0], [], []>} : vector<17x32xbf16>, vector<17x32xbf16>, vector<17x17xf32> -> vector<17x17xf32>
    %cst_31 = arith.constant dense<0xFF800000> : vector<17xf32>
    %83 = vector.multi_reduction <maximumf>, %82, %cst_31 [1] : vector<17x17xf32> to vector<17xf32>
    %84 = vector.shape_cast %83 : vector<17xf32> to vector<17x1xf32>
    %85 = vector.broadcast %84 : vector<17x1xf32> to vector<17x17xf32>
    %86 = arith.subf %82, %85 : vector<17x17xf32>
    %87 = math.exp %86 : vector<17x17xf32>
    %cst_32 = arith.constant dense<0.000000e+00> : vector<17xf32>
    %88 = vector.multi_reduction <add>, %87, %cst_32 [1] : vector<17x17xf32> to vector<17xf32>
    %89 = vector.shape_cast %88 : vector<17xf32> to vector<17x1xf32>
    %90 = tpu.reciprocal %89 {approx = true} : vector<17x1xf32> -> vector<17x1xf32>
    %91 = vector.broadcast %90 : vector<17x1xf32> to vector<17x17xf32>
    %92 = arith.mulf %87, %91 : vector<17x17xf32>
    %93 = arith.truncf %92 : vector<17x17xf32> to vector<17x17xbf16>
    %cst_33 = arith.constant dense<0.000000e+00> : vector<17x32xf32>
    %94 = tpu.matmul %93, %81, %cst_33 {dimension_numbers = #tpu.dot_dimension_numbers<[1], [0], [0], [1], [0, 0, 1, 1], [], []>} : vector<17x17xbf16>, vector<17x32xbf16>, vector<17x32xf32> -> vector<17x32xf32>
    %95 = arith.truncf %94 : vector<17x32xf32> to vector<17x32xbf16>
    %c64 = arith.constant 64 : index
    %c0_34 = arith.constant 0 : index
    %96 = vector.load %arg6[%c64, %c0_34] : memref<128x128xbf16, #tpu.memory_space<vmem>>, vector<32x128xbf16>
    %cst_35 = arith.constant dense<0.000000e+00> : vector<17x128xf32>
    %97 = tpu.matmul %95, %96, %cst_35 {dimension_numbers = #tpu.dot_dimension_numbers<[1], [0], [0], [1], [0, 0, 1, 1], [], []>} : vector<17x32xbf16>, vector<32x128xbf16>, vector<17x128xf32> -> vector<17x128xf32>
    %98 = arith.addf %78, %97 : vector<17x128xf32>
    %99 = vector.extract_strided_slice %33 {offsets = [0, 96], sizes = [17, 32], strides = [1, 1]} : vector<17x128xbf16> to vector<17x32xbf16>
    %100 = vector.extract_strided_slice %35 {offsets = [0, 96], sizes = [17, 32], strides = [1, 1]} : vector<17x128xbf16> to vector<17x32xbf16>
    %101 = vector.extract_strided_slice %37 {offsets = [0, 96], sizes = [17, 32], strides = [1, 1]} : vector<17x128xbf16> to vector<17x32xbf16>
    %cst_36 = arith.constant dense<0.000000e+00> : vector<17x17xf32>
    %102 = tpu.matmul %99, %100, %cst_36 {dimension_numbers = #tpu.dot_dimension_numbers<[1], [1], [0], [0], [0, 0, 1, 0], [], []>} : vector<17x32xbf16>, vector<17x32xbf16>, vector<17x17xf32> -> vector<17x17xf32>
    %cst_37 = arith.constant dense<0xFF800000> : vector<17xf32>
    %103 = vector.multi_reduction <maximumf>, %102, %cst_37 [1] : vector<17x17xf32> to vector<17xf32>
    %104 = vector.shape_cast %103 : vector<17xf32> to vector<17x1xf32>
    %105 = vector.broadcast %104 : vector<17x1xf32> to vector<17x17xf32>
    %106 = arith.subf %102, %105 : vector<17x17xf32>
    %107 = math.exp %106 : vector<17x17xf32>
    %cst_38 = arith.constant dense<0.000000e+00> : vector<17xf32>
    %108 = vector.multi_reduction <add>, %107, %cst_38 [1] : vector<17x17xf32> to vector<17xf32>
    %109 = vector.shape_cast %108 : vector<17xf32> to vector<17x1xf32>
    %110 = tpu.reciprocal %109 {approx = true} : vector<17x1xf32> -> vector<17x1xf32>
    %111 = vector.broadcast %110 : vector<17x1xf32> to vector<17x17xf32>
    %112 = arith.mulf %107, %111 : vector<17x17xf32>
    %113 = arith.truncf %112 : vector<17x17xf32> to vector<17x17xbf16>
    %cst_39 = arith.constant dense<0.000000e+00> : vector<17x32xf32>
    %114 = tpu.matmul %113, %101, %cst_39 {dimension_numbers = #tpu.dot_dimension_numbers<[1], [0], [0], [1], [0, 0, 1, 1], [], []>} : vector<17x17xbf16>, vector<17x32xbf16>, vector<17x32xf32> -> vector<17x32xf32>
    %115 = arith.truncf %114 : vector<17x32xf32> to vector<17x32xbf16>
    %c96 = arith.constant 96 : index
    %c0_40 = arith.constant 0 : index
    %116 = vector.load %arg6[%c96, %c0_40] : memref<128x128xbf16, #tpu.memory_space<vmem>>, vector<32x128xbf16>
    %cst_41 = arith.constant dense<0.000000e+00> : vector<17x128xf32>
    %117 = tpu.matmul %115, %116, %cst_41 {dimension_numbers = #tpu.dot_dimension_numbers<[1], [0], [0], [1], [0, 0, 1, 1], [], []>} : vector<17x32xbf16>, vector<32x128xbf16>, vector<17x128xf32> -> vector<17x128xf32>
    %118 = arith.addf %98, %117 : vector<17x128xf32>
    %119 = arith.addf %1, %118 : vector<17x128xf32>
    %c0_42 = arith.constant 0 : index
    %c0_43 = arith.constant 0 : index
    %120 = vector.load %arg7[%c0_42, %c0_43] : memref<1x128xf32, #tpu.memory_space<vmem>>, vector<1x128xf32>
    %121 = vector.broadcast %120 : vector<1x128xf32> to vector<17x128xf32>
    %122 = arith.addf %119, %121 : vector<17x128xf32>
    %c0_44 = arith.constant 0 : index
    %c0_45 = arith.constant 0 : index
    %123 = vector.load %arg8[%c0_44, %c0_45] : memref<1x128xf32, #tpu.memory_space<vmem>>, vector<1x128xf32>
    %c0_46 = arith.constant 0 : index
    %c0_47 = arith.constant 0 : index
    %124 = vector.load %arg9[%c0_46, %c0_47] : memref<1x128xf32, #tpu.memory_space<vmem>>, vector<1x128xf32>
    %cst_48 = arith.constant dense<0.000000e+00> : vector<17xf32>
    %125 = vector.multi_reduction <add>, %122, %cst_48 [1] : vector<17x128xf32> to vector<17xf32>
    %126 = vector.shape_cast %125 : vector<17xf32> to vector<17x1xf32>
    %cst_49 = arith.constant 1.280000e+02 : f32
    %127 = vector.broadcast %cst_49 : f32 to vector<17x1xf32>
    %128 = arith.divf %126, %127 : vector<17x1xf32>
    %129 = vector.broadcast %128 : vector<17x1xf32> to vector<17x128xf32>
    %130 = arith.subf %122, %129 : vector<17x128xf32>
    %131 = arith.mulf %130, %130 : vector<17x128xf32>
    %cst_50 = arith.constant dense<0.000000e+00> : vector<17xf32>
    %132 = vector.multi_reduction <add>, %131, %cst_50 [1] : vector<17x128xf32> to vector<17xf32>
    %133 = vector.shape_cast %132 : vector<17xf32> to vector<17x1xf32>
    %cst_51 = arith.constant 1.280000e+02 : f32
    %134 = vector.broadcast %cst_51 : f32 to vector<17x1xf32>
    %135 = arith.divf %133, %134 : vector<17x1xf32>
    %cst_52 = arith.constant 9.99999997E-7 : f32
    %136 = vector.broadcast %cst_52 : f32 to vector<17x1xf32>
    %137 = arith.addf %135, %136 : vector<17x1xf32>
    %138 = math.rsqrt %137 : vector<17x1xf32>
    %139 = vector.broadcast %138 : vector<17x1xf32> to vector<17x128xf32>
    %140 = arith.mulf %130, %139 : vector<17x128xf32>
    %141 = vector.broadcast %123 : vector<1x128xf32> to vector<17x128xf32>
    %142 = arith.mulf %140, %141 : vector<17x128xf32>
    %143 = vector.broadcast %124 : vector<1x128xf32> to vector<17x128xf32>
    %144 = arith.addf %142, %143 : vector<17x128xf32>
    %145 = arith.truncf %144 : vector<17x128xf32> to vector<17x128xbf16>
    %c0_53 = arith.constant 0 : index
    %c0_54 = arith.constant 0 : index
    %146 = vector.load %arg10[%c0_53, %c0_54] : memref<128x512xbf16, #tpu.memory_space<vmem>>, vector<128x512xbf16>
    %cst_55 = arith.constant dense<0.000000e+00> : vector<17x512xf32>
    %147 = tpu.matmul %145, %146, %cst_55 {dimension_numbers = #tpu.dot_dimension_numbers<[1], [0], [0], [1], [0, 0, 1, 1], [], []>} : vector<17x128xbf16>, vector<128x512xbf16>, vector<17x512xf32> -> vector<17x512xf32>
    %c0_56 = arith.constant 0 : index
    %c0_57 = arith.constant 0 : index
    %148 = vector.load %arg11[%c0_56, %c0_57] : memref<1x512xf32, #tpu.memory_space<vmem>>, vector<1x512xf32>
    %149 = vector.broadcast %148 : vector<1x512xf32> to vector<17x512xf32>
    %150 = arith.addf %147, %149 : vector<17x512xf32>
    %cst_58 = arith.constant 5.000000e-01 : f32
    %151 = vector.broadcast %cst_58 : f32 to vector<17x512xf32>
    %152 = arith.mulf %151, %150 : vector<17x512xf32>
    %cst_59 = arith.constant 0.707106769 : f32
    %153 = vector.broadcast %cst_59 : f32 to vector<17x512xf32>
    %154 = arith.mulf %150, %153 : vector<17x512xf32>
    %155 = math.absf %154 : vector<17x512xf32>
    %cst_60 = arith.constant 0.327591091 : f32
    %156 = vector.broadcast %cst_60 : f32 to vector<17x512xf32>
    %157 = arith.mulf %156, %155 : vector<17x512xf32>
    %cst_61 = arith.constant 1.000000e+00 : f32
    %158 = vector.broadcast %cst_61 : f32 to vector<17x512xf32>
    %159 = arith.addf %158, %157 : vector<17x512xf32>
    %cst_62 = arith.constant 1.000000e+00 : f32
    %160 = vector.broadcast %cst_62 : f32 to vector<17x512xf32>
    %161 = arith.divf %160, %159 : vector<17x512xf32>
    %cst_63 = arith.constant 1.06140542 : f32
    %162 = vector.broadcast %cst_63 : f32 to vector<17x512xf32>
    %163 = arith.mulf %162, %161 : vector<17x512xf32>
    %cst_64 = arith.constant -1.45315206 : f32
    %164 = vector.broadcast %cst_64 : f32 to vector<17x512xf32>
    %165 = arith.addf %163, %164 : vector<17x512xf32>
    %166 = arith.mulf %165, %161 : vector<17x512xf32>
    %cst_65 = arith.constant 1.42141378 : f32
    %167 = vector.broadcast %cst_65 : f32 to vector<17x512xf32>
    %168 = arith.addf %166, %167 : vector<17x512xf32>
    %169 = arith.mulf %168, %161 : vector<17x512xf32>
    %cst_66 = arith.constant -0.284496725 : f32
    %170 = vector.broadcast %cst_66 : f32 to vector<17x512xf32>
    %171 = arith.addf %169, %170 : vector<17x512xf32>
    %172 = arith.mulf %171, %161 : vector<17x512xf32>
    %cst_67 = arith.constant 0.254829586 : f32
    %173 = vector.broadcast %cst_67 : f32 to vector<17x512xf32>
    %174 = arith.addf %172, %173 : vector<17x512xf32>
    %175 = arith.mulf %174, %161 : vector<17x512xf32>
    %cst_68 = arith.constant 0.000000e+00 : f32
    %176 = vector.broadcast %cst_68 : f32 to vector<17x512xf32>
    %177 = arith.subf %176, %155 : vector<17x512xf32>
    %178 = arith.mulf %177, %155 : vector<17x512xf32>
    %179 = math.exp %178 : vector<17x512xf32>
    %180 = arith.mulf %175, %179 : vector<17x512xf32>
    %cst_69 = arith.constant 1.000000e+00 : f32
    %181 = vector.broadcast %cst_69 : f32 to vector<17x512xf32>
    %182 = arith.subf %181, %180 : vector<17x512xf32>
    %cst_70 = arith.constant 0.000000e+00 : f32
    %183 = vector.broadcast %cst_70 : f32 to vector<17x512xf32>
    %184 = arith.cmpf oge, %154, %183 : vector<17x512xf32>
    %cst_71 = arith.constant 0.000000e+00 : f32
    %185 = vector.broadcast %cst_71 : f32 to vector<17x512xf32>
    %186 = arith.subf %185, %182 : vector<17x512xf32>
    %187 = arith.select %184, %182, %186 : vector<17x512xi1>, vector<17x512xf32>
    %cst_72 = arith.constant 1.000000e+00 : f32
    %188 = vector.broadcast %cst_72 : f32 to vector<17x512xf32>
    %189 = arith.addf %188, %187 : vector<17x512xf32>
    %190 = arith.mulf %152, %189 : vector<17x512xf32>
    %191 = arith.truncf %190 : vector<17x512xf32> to vector<17x512xbf16>
    %c0_73 = arith.constant 0 : index
    %c0_74 = arith.constant 0 : index
    %192 = vector.load %arg12[%c0_73, %c0_74] : memref<512x128xbf16, #tpu.memory_space<vmem>>, vector<512x128xbf16>
    %cst_75 = arith.constant dense<0.000000e+00> : vector<17x128xf32>
    %193 = tpu.matmul %191, %192, %cst_75 {dimension_numbers = #tpu.dot_dimension_numbers<[1], [0], [0], [1], [0, 0, 1, 1], [], []>} : vector<17x512xbf16>, vector<512x128xbf16>, vector<17x128xf32> -> vector<17x128xf32>
    %c0_76 = arith.constant 0 : index
    %c0_77 = arith.constant 0 : index
    %194 = vector.load %arg13[%c0_76, %c0_77] : memref<1x128xf32, #tpu.memory_space<vmem>>, vector<1x128xf32>
    %195 = vector.broadcast %194 : vector<1x128xf32> to vector<17x128xf32>
    %196 = arith.addf %193, %195 : vector<17x128xf32>
    %197 = arith.addf %122, %196 : vector<17x128xf32>
    %c0_78 = arith.constant 0 : index
    %c0_79 = arith.constant 0 : index
    %c0_80 = arith.constant 0 : index
    %198 = vector.load %arg14[%c0_78, %c0_79, %c0_80] : memref<1x17x128xf32, #tpu.memory_space<vmem>>, vector<1x17x128xf32>
    %199 = vector.shape_cast %198 : vector<1x17x128xf32> to vector<17x128xf32>
    %200 = vector.shape_cast %197 : vector<17x128xf32> to vector<1x17x128xf32>
    tpu.vector_store %arg14[%c0_78, %c0_79, %c0_80], %200 {strides = array<i32>} : memref<1x17x128xf32, #tpu.memory_space<vmem>>, vector<1x17x128xf32>,
    return
  }
  func.func @transform_0(%arg0: i32) -> (i32, i32, i32) {
    %c0_i32 = arith.constant 0 : i32
    %c0_i32_0 = arith.constant 0 : i32
    %c0_i32_1 = arith.constant 0 : i32
    return %arg0, %c0_i32, %c0_i32_0 : i32, i32, i32
  }
  func.func @transform_1(%arg0: i32) -> (i32, i32) {
    %c0_i32 = arith.constant 0 : i32
    %c0_i32_0 = arith.constant 0 : i32
    %c0_i32_1 = arith.constant 0 : i32
    return %c0_i32, %c0_i32_0 : i32, i32
  }
  func.func @transform_2(%arg0: i32) -> (i32, i32) {
    %c0_i32 = arith.constant 0 : i32
    %c0_i32_0 = arith.constant 0 : i32
    %c0_i32_1 = arith.constant 0 : i32
    return %c0_i32, %c0_i32_0 : i32, i32
  }
  func.func @transform_3(%arg0: i32) -> (i32, i32) {
    %c0_i32 = arith.constant 0 : i32
    %c0_i32_0 = arith.constant 0 : i32
    %c0_i32_1 = arith.constant 0 : i32
    return %c0_i32, %c0_i32_0 : i32, i32
  }
  func.func @transform_4(%arg0: i32) -> (i32, i32) {
    %c0_i32 = arith.constant 0 : i32
    %c0_i32_0 = arith.constant 0 : i32
    %c0_i32_1 = arith.constant 0 : i32
    return %c0_i32, %c0_i32_0 : i32, i32
  }
  func.func @transform_5(%arg0: i32) -> (i32, i32) {
    %c0_i32 = arith.constant 0 : i32
    %c0_i32_0 = arith.constant 0 : i32
    %c0_i32_1 = arith.constant 0 : i32
    return %c0_i32, %c0_i32_0 : i32, i32
  }
  func.func @transform_6(%arg0: i32) -> (i32, i32) {
    %c0_i32 = arith.constant 0 : i32
    %c0_i32_0 = arith.constant 0 : i32
    %c0_i32_1 = arith.constant 0 : i32
    return %c0_i32, %c0_i32_0 : i32, i32
  }
  func.func @transform_7(%arg0: i32) -> (i32, i32) {
    %c0_i32 = arith.constant 0 : i32
    %c0_i32_0 = arith.constant 0 : i32
    %c0_i32_1 = arith.constant 0 : i32
    return %c0_i32, %c0_i32_0 : i32, i32
  }
  func.func @transform_8(%arg0: i32) -> (i32, i32) {
    %c0_i32 = arith.constant 0 : i32
    %c0_i32_0 = arith.constant 0 : i32
    %c0_i32_1 = arith.constant 0 : i32
    return %c0_i32, %c0_i32_0 : i32, i32
  }
  func.func @transform_9(%arg0: i32) -> (i32, i32) {
    %c0_i32 = arith.constant 0 : i32
    %c0_i32_0 = arith.constant 0 : i32
    %c0_i32_1 = arith.constant 0 : i32
    return %c0_i32, %c0_i32_0 : i32, i32
  }
  func.func @transform_10(%arg0: i32) -> (i32, i32) {
    %c0_i32 = arith.constant 0 : i32
    %c0_i32_0 = arith.constant 0 : i32
    %c0_i32_1 = arith.constant 0 : i32
    return %c0_i32, %c0_i32_0 : i32, i32
  }
  func.func @transform_11(%arg0: i32) -> (i32, i32) {
    %c0_i32 = arith.constant 0 : i32
    %c0_i32_0 = arith.constant 0 : i32
    %c0_i32_1 = arith.constant 0 : i32
    return %c0_i32, %c0_i32_0 : i32, i32
  }
  func.func @transform_12(%arg0: i32) -> (i32, i32) {
    %c0_i32 = arith.constant 0 : i32
    %c0_i32_0 = arith.constant 0 : i32
    %c0_i32_1 = arith.constant 0 : i32
    return %c0_i32, %c0_i32_0 : i32, i32
  }
  func.func @transform_13(%arg0: i32) -> (i32, i32, i32) {
    %c0_i32 = arith.constant 0 : i32
    %c0_i32_0 = arith.constant 0 : i32
    %c0_i32_1 = arith.constant 0 : i32
    return %arg0, %c0_i32, %c0_i32_0 : i32, i32, i32
  }
}

module attributes {stable_mosaic.version = 11 : i64} {
  func.func @_ln_head_kernel(%arg0: i32, %arg1: memref<2x128xf32, #tpu.memory_space<vmem>>, %arg2: memref<1x128xf32, #tpu.memory_space<vmem>>, %arg3: memref<1x128xf32, #tpu.memory_space<vmem>>, %arg4: memref<128x128xbf16, #tpu.memory_space<vmem>>, %arg5: memref<1x128xf32, #tpu.memory_space<vmem>>, %arg6: memref<2x128xf32, #tpu.memory_space<vmem>>) attributes {dimension_semantics = [#tpu.dimension_semantics<arbitrary>], iteration_bounds = array<i64: 1>, scalar_prefetch = 0 : i64, scratch_operands = 0 : i64, tpu.core_type = #tpu.core_type<tc>, window_params = [{pipeline_mode = #tpu.pipeline_mode<synchronous>, transform_indices = @transform_0, window_bounds = array<i64: 2, 128>}, {pipeline_mode = #tpu.pipeline_mode<synchronous>, transform_indices = @transform_1, window_bounds = array<i64: 1, 128>}, {pipeline_mode = #tpu.pipeline_mode<synchronous>, transform_indices = @transform_2, window_bounds = array<i64: 1, 128>}, {pipeline_mode = #tpu.pipeline_mode<synchronous>, transform_indices = @transform_3, window_bounds = array<i64: 128, 128>}, {pipeline_mode = #tpu.pipeline_mode<synchronous>, transform_indices = @transform_4, window_bounds = array<i64: 1, 128>}, {pipeline_mode = #tpu.pipeline_mode<synchronous>, transform_indices = @transform_5, window_bounds = array<i64: 2, 128>}]} {
    %c0 = arith.constant 0 : index
    %c0_0 = arith.constant 0 : index
    %0 = vector.load %arg1[%c0, %c0_0] : memref<2x128xf32, #tpu.memory_space<vmem>>, vector<2x128xf32>
    %c0_1 = arith.constant 0 : index
    %c0_2 = arith.constant 0 : index
    %1 = vector.load %arg2[%c0_1, %c0_2] : memref<1x128xf32, #tpu.memory_space<vmem>>, vector<1x128xf32>
    %c0_3 = arith.constant 0 : index
    %c0_4 = arith.constant 0 : index
    %2 = vector.load %arg3[%c0_3, %c0_4] : memref<1x128xf32, #tpu.memory_space<vmem>>, vector<1x128xf32>
    %cst = arith.constant dense<0.000000e+00> : vector<2xf32>
    %3 = vector.multi_reduction <add>, %0, %cst [1] : vector<2x128xf32> to vector<2xf32>
    %4 = vector.shape_cast %3 : vector<2xf32> to vector<2x1xf32>
    %cst_5 = arith.constant 1.280000e+02 : f32
    %5 = vector.broadcast %cst_5 : f32 to vector<2x1xf32>
    %6 = arith.divf %4, %5 : vector<2x1xf32>
    %7 = vector.broadcast %6 : vector<2x1xf32> to vector<2x128xf32>
    %8 = arith.subf %0, %7 : vector<2x128xf32>
    %9 = arith.mulf %8, %8 : vector<2x128xf32>
    %cst_6 = arith.constant dense<0.000000e+00> : vector<2xf32>
    %10 = vector.multi_reduction <add>, %9, %cst_6 [1] : vector<2x128xf32> to vector<2xf32>
    %11 = vector.shape_cast %10 : vector<2xf32> to vector<2x1xf32>
    %cst_7 = arith.constant 1.280000e+02 : f32
    %12 = vector.broadcast %cst_7 : f32 to vector<2x1xf32>
    %13 = arith.divf %11, %12 : vector<2x1xf32>
    %cst_8 = arith.constant 9.99999997E-7 : f32
    %14 = vector.broadcast %cst_8 : f32 to vector<2x1xf32>
    %15 = arith.addf %13, %14 : vector<2x1xf32>
    %16 = math.rsqrt %15 : vector<2x1xf32>
    %17 = vector.broadcast %16 : vector<2x1xf32> to vector<2x128xf32>
    %18 = arith.mulf %8, %17 : vector<2x128xf32>
    %19 = vector.broadcast %1 : vector<1x128xf32> to vector<2x128xf32>
    %20 = arith.mulf %18, %19 : vector<2x128xf32>
    %21 = vector.broadcast %2 : vector<1x128xf32> to vector<2x128xf32>
    %22 = arith.addf %20, %21 : vector<2x128xf32>
    %23 = arith.truncf %22 : vector<2x128xf32> to vector<2x128xbf16>
    %c0_9 = arith.constant 0 : index
    %c0_10 = arith.constant 0 : index
    %24 = vector.load %arg4[%c0_9, %c0_10] : memref<128x128xbf16, #tpu.memory_space<vmem>>, vector<128x128xbf16>
    %cst_11 = arith.constant dense<0.000000e+00> : vector<2x128xf32>
    %25 = tpu.matmul %23, %24, %cst_11 {dimension_numbers = #tpu.dot_dimension_numbers<[1], [0], [0], [1], [0, 0, 1, 1], [], []>} : vector<2x128xbf16>, vector<128x128xbf16>, vector<2x128xf32> -> vector<2x128xf32>
    %c0_12 = arith.constant 0 : index
    %c0_13 = arith.constant 0 : index
    %26 = vector.load %arg5[%c0_12, %c0_13] : memref<1x128xf32, #tpu.memory_space<vmem>>, vector<1x128xf32>
    %27 = vector.broadcast %26 : vector<1x128xf32> to vector<2x128xf32>
    %28 = arith.addf %25, %27 : vector<2x128xf32>
    %c0_14 = arith.constant 0 : index
    %c0_15 = arith.constant 0 : index
    %29 = vector.load %arg6[%c0_14, %c0_15] : memref<2x128xf32, #tpu.memory_space<vmem>>, vector<2x128xf32>
    tpu.vector_store %arg6[%c0_14, %c0_15], %28 {strides = array<i32>} : memref<2x128xf32, #tpu.memory_space<vmem>>, vector<2x128xf32>,
    return
  }
  func.func @transform_0(%arg0: i32) -> (i32, i32) {
    %c0_i32 = arith.constant 0 : i32
    %c0_i32_0 = arith.constant 0 : i32
    %c0_i32_1 = arith.constant 0 : i32
    return %c0_i32, %c0_i32_0 : i32, i32
  }
  func.func @transform_1(%arg0: i32) -> (i32, i32) {
    %c0_i32 = arith.constant 0 : i32
    %c0_i32_0 = arith.constant 0 : i32
    %c0_i32_1 = arith.constant 0 : i32
    return %c0_i32, %c0_i32_0 : i32, i32
  }
  func.func @transform_2(%arg0: i32) -> (i32, i32) {
    %c0_i32 = arith.constant 0 : i32
    %c0_i32_0 = arith.constant 0 : i32
    %c0_i32_1 = arith.constant 0 : i32
    return %c0_i32, %c0_i32_0 : i32, i32
  }
  func.func @transform_3(%arg0: i32) -> (i32, i32) {
    %c0_i32 = arith.constant 0 : i32
    %c0_i32_0 = arith.constant 0 : i32
    %c0_i32_1 = arith.constant 0 : i32
    return %c0_i32, %c0_i32_0 : i32, i32
  }
  func.func @transform_4(%arg0: i32) -> (i32, i32) {
    %c0_i32 = arith.constant 0 : i32
    %c0_i32_0 = arith.constant 0 : i32
    %c0_i32_1 = arith.constant 0 : i32
    return %c0_i32, %c0_i32_0 : i32, i32
  }
  func.func @transform_5(%arg0: i32) -> (i32, i32) {
    %c0_i32 = arith.constant 0 : i32
    %c0_i32_0 = arith.constant 0 : i32
    %c0_i32_1 = arith.constant 0 : i32
    return %c0_i32, %c0_i32_0 : i32, i32
  }
}

</mosaic_0001>

<bundles_post_ra>
// kernel: vit_forward.4
= control target key start
LH: loop header
LB: loop body
LE: loop exit
PB: predicated region body
PF: predicated region fallthrough
CT: control target
= control target key end

     0   :  { %s972_s12 = smov 0   ;;  %s1158_s0 = inlined_call_operand.vmem [shape: f32[2,16,768], index: 0, kind: input, shape index: {}]   ;;  %s1159_s1 = inlined_call_operand.vmem [shape: bf16[768,128], index: 1, kind: input, shape index: {}]   ;;  %s1160_s2 = inlined_call_operand.vmem [shape: f32[1,128], index: 2, kind: input, shape index: {}]   ;;  %s1161_s3 = inlined_call_operand.vmem [shape: f32[2,16,128], index: 3, kind: output, shape index: {}]  }
   0x1 LB: > { %s761_s13 = sadd.s32 4294967295, %s950_s12   ;;  %p765_p0 = scmp.ge.s32.totalorder %s950_s12, 1  ;;  %s950_s12 = sphi %s972_s12, %s13_s12  }
   0x2   : > { %p137_p1 = scmp.lt.s32.totalorder %s950_s12, 3 }
   0x4   : > { %p138_p2 = pnand %p765_p0, %p137_p1 }
   0x5   : > { %v896_v0 = vld [vmem:[%s1159_s1 + $0x40] sm:$0xff] (!%p138_p2)   ;;  %v900_v4 = vld [vmem:[%s1159_s1 + $0x48] sm:$0xff] (!%p138_p2)   ;;  %v904_v8 = vld [vmem:[%s1159_s1 + $0x50] sm:$0xff] (!%p138_p2)   ;;  %p161_p3 = scmp.lt.s32.totalorder (!%p138_p2), %s761_s13, 1 }
   0x6   : > { %141 = sbr.rel (%p138_p2) target bundleno = 290 (0x122), region = 32  ;;  %v897_v1 = vld [vmem:[%s1159_s1] sm:$0xff] (!%p138_p2)   ;;  %821 = vmatprep.subr.bf16.mxu0 (!%p138_p2), %v896_v0  ;;  %v901_v5 = vld [vmem:[%s1159_s1 + $0x8] sm:$0xff] (!%p138_p2)   ;;  %v905_v9 = vld [vmem:[%s1159_s1 + $0x10] sm:$0xff] (!%p138_p2)  }
   0x7   : > { %v898_v2 = vld [vmem:[%s1159_s1 + $0xc0] sm:$0xff] (!%p138_p2)   ;;  %822 = vmatpush3.bf16.msra.mxu0 (!%p138_p2), %v897_v1  ;;  %v902_v6 = vld [vmem:[%s1159_s1 + $0xc8] sm:$0xff] (!%p138_p2)   ;;  %v906_v10 = vld [vmem:[%s1159_s1 + $0xd0] sm:$0xff] (!%p138_p2)  }
   0x8   : > { %v899_v3 = vld [vmem:[%s1159_s1 + $0x80] sm:$0xff] (!%p138_p2)   ;;  %843 = vmatprep.subr.bf16.mxu1 (!%p138_p2), %v898_v2  ;;  %823 = vmatprep.subr.bf16.mxu0 (!%p138_p2), %v900_v4  ;;  %v903_v7 = vld [vmem:[%s1159_s1 + $0x88] sm:$0xff] (!%p138_p2)   ;;  %v907_v11 = vld [vmem:[%s1159_s1 + $0x90] sm:$0xff] (!%p138_p2)  }
   0x9   : > { %844 = vmatpush3.bf16.msra.mxu1 (!%p138_p2), %v899_v3  ;;  %v908_v12 = vld [vmem:[%s1159_s1 + $0x58] sm:$0xff] (!%p138_p2)   ;;  %v912_v16 = vld [vmem:[%s1159_s1 + $0x60] sm:$0xff] (!%p138_p2)   ;;  %v916_v20 = vld [vmem:[%s1159_s1 + $0x68] sm:$0xff] (!%p138_p2)  }
   0xa   : > { %845 = vmatprep.subr.bf16.mxu1 (!%p138_p2), %v902_v6  ;;  %v909_v13 = vld [vmem:[%s1159_s1 + $0x18] sm:$0xff] (!%p138_p2)   ;;  %v913_v17 = vld [vmem:[%s1159_s1 + $0x20] sm:$0xff] (!%p138_p2)   ;;  %v917_v21 = vld [vmem:[%s1159_s1 + $0x28] sm:$0xff] (!%p138_p2)  }
   0xb   : > { %824 = vmatpush3.bf16.msra.mxu0 (!%p138_p2), %v901_v5  ;;  %v910_v14 = vld [vmem:[%s1159_s1 + $0xd8] sm:$0xff] (!%p138_p2)   ;;  %v914_v18 = vld [vmem:[%s1159_s1 + $0xe0] sm:$0xff] (!%p138_p2)   ;;  %v918_v22 = vld [vmem:[%s1159_s1 + $0xe8] sm:$0xff] (!%p138_p2)  }
   0xc   : > { %825 = vmatprep.subr.bf16.mxu0 (!%p138_p2), %v904_v8  ;;  %v911_v15 = vld [vmem:[%s1159_s1 + $0x98] sm:$0xff] (!%p138_p2)   ;;  %v915_v19 = vld [vmem:[%s1159_s1 + $0xa0] sm:$0xff] (!%p138_p2)   ;;  %v919_v23 = vld [vmem:[%s1159_s1 + $0xa8] sm:$0xff] (!%p138_p2)  }
   0xd   : > { %846 = vmatpush3.bf16.msra.mxu1 %v903_v7  ;;  %s1163_s13 = smov (!%p161_p3, %s761_s13), 1  ;;  %v920_v24 = vld [vmem:[%s1159_s1 + $0x70] sm:$0xff]   ;;  %v924_v28 = vld [vmem:[%s1159_s1 + $0x78] sm:$0xff]   ;;  %v928_v38 = vld [vmem:[%s1159_s1 + $0x140] sm:$0xff]  }
   0xe   : > { %847 = vmatprep.subr.bf16.mxu1 %v906_v10  ;;  %s887_s14 = smul.u32 96, %s1163_s13  ;;  %v921_v25 = vld [vmem:[%s1159_s1 + $0x30] sm:$0xff]   ;;  %v925_v29 = vld [vmem:[%s1159_s1 + $0x38] sm:$0xff]   ;;  %v929_v42 = vld [vmem:[%s1159_s1 + $0x100] sm:$0xff]  }
   0xf   : > { %826 = vmatpush3.bf16.msra.mxu0 %v905_v9  ;;  %v922_v26 = vld [vmem:[%s1159_s1 + $0xf0] sm:$0xff]   ;;  %v926_v30 = vld [vmem:[%s1159_s1 + $0xf8] sm:$0xff]   ;;  %v930_v46 = vld [vmem:[%s1159_s1 + $0x148] sm:$0xff]  }
  0x10   : > { %827 = vmatprep.subr.bf16.mxu0 %v908_v12  ;;  %v923_v27 = vld [vmem:[%s1159_s1 + $0xb0] sm:$0xff]   ;;  %s1077_s25 = scalar_lea.vmem %s1158_s0, %s887_s14  ;;  %v927_v34 = vld [vmem:[%s1159_s1 + $0xb8] sm:$0xff]   ;;  %v931_v47 = vld [vmem:[%s1159_s1 + $0x108] sm:$0xff]  }
  0x11   : > { %848 = vmatpush3.bf16.msra.mxu1 %v907_v11  ;;  %v173_v31 = vld [vmem:[%s1077_s25 + $0x8] sm:$0xff]  ;;  %v179_v32 = vld [vmem:[%s1077_s25 + $0x38] sm:$0xff]  ;;  %v172_v35 = vld [vmem:[%s1077_s25] sm:$0xff] }
  0x12   : > { %849 = vmatprep.subr.bf16.mxu1 %v910_v14  ;;  %v185_v33 = vpack.c.bf16 %v179_v32, %v173_v31  ;;  %v178_v36 = vld [vmem:[%s1077_s25 + $0x30] sm:$0xff]  ;;  %v175_v39 = vld [vmem:[%s1077_s25 + $0x18] sm:$0xff]  ;;  %v181_v40 = vld [vmem:[%s1077_s25 + $0x48] sm:$0xff] }
  0x13   : > { %828 = vmatpush3.bf16.msra.mxu0 %v909_v13  ;;  %v184_v37 = vpack.c.bf16 %v178_v36, %v172_v35  ;;  %v187_v41 = vpack.c.bf16 %v181_v40, %v175_v39  ;;  %v174_v43 = vld [vmem:[%s1077_s25 + $0x10] sm:$0xff]  ;;  %v180_v44 = vld [vmem:[%s1077_s25 + $0x40] sm:$0xff]  ;;  %v934_v50 = vld [vmem:[%s1159_s1 + $0x158] sm:$0xff]  }
  0x14   : > { %829 = vmatprep.subr.bf16.mxu0 %v912_v16  ;;  %613 = vmatprep.mubr.bf16.mxu0 %v185_v33  ;;  %v186_v45 = vpack.c.bf16 %v180_v44, %v174_v43  ;;  %v932_v48 = vld [vmem:[%s1159_s1 + $0x150] sm:$0xff]   ;;  %v935_v51 = vld [vmem:[%s1159_s1 + $0x118] sm:$0xff]   ;;  %v936_v52 = vld [vmem:[%s1159_s1 + $0x160] sm:$0xff]  }
  0x15   : > { %850 = vmatpush3.bf16.msra.mxu1 %v911_v15  ;;  %654 = vmatprep.mubr.bf16.mxu1 %v187_v41  ;;  %v933_v49 = vld [vmem:[%s1159_s1 + $0x110] sm:$0xff]   ;;  %v937_v53 = vld [vmem:[%s1159_s1 + $0x120] sm:$0xff]   ;;  %v938_v54 = vld [vmem:[%s1159_s1 + $0x168] sm:$0xff]  }
  0x16   : > { %851 = vmatprep.subr.bf16.mxu1 %v914_v18  ;;  %v177_v55 = vld [vmem:[%s1077_s25 + $0x28] sm:$0xff]  ;;  %v183_v56 = vld [vmem:[%s1077_s25 + $0x58] sm:$0xff]  ;;  %v940_v59 = vld [vmem:[%s1159_s1 + $0x170] sm:$0xff]  }
  0x17   : > { %830 = vmatpush3.bf16.msra.mxu0 %v913_v17  ;;  %v189_v57 = vpack.c.bf16 %v183_v56, %v177_v55  ;;  %v939_v58 = vld [vmem:[%s1159_s1 + $0x128] sm:$0xff]   ;;  %v941_v60 = vld [vmem:[%s1159_s1 + $0x130] sm:$0xff]   ;;  %v942_v61 = vld [vmem:[%s1159_s1 + $0x178] sm:$0xff]  }
  0x18   : > { %831 = vmatprep.subr.bf16.mxu0 %v916_v20  ;;  %v943_v62 = vld [vmem:[%s1159_s1 + $0x138] sm:$0xff]   ;;  %v176_v63 = vld [vmem:[%s1077_s25 + $0x20] sm:$0xff]  ;;  %v182_v0 = vld [vmem:[%s1077_s25 + $0x50] sm:$0xff]  ;;  %s820_s25 = sshll.u32 %s1163_s13, 4 }
  0x19   : > { %852 = vmatpush3.bf16.msra.mxu1 %v915_v19  ;;  %v188_v1 = vpack.c.bf16 %v182_v0, %v176_v63  ;;  %v769_v3 = vld [vmem:[%s1160_s2] ss:$0 sm:$0xff]  ;;  %s170_s19 = scalar_lea.vmem %s1161_s3, %s820_s25 }
  0x1a   : > { %853 = vmatprep.subr.bf16.mxu1 %v918_v22 }
  0x1b   : > { %832 = vmatpush3.bf16.msra.mxu0 %v917_v21 }
  0x1c   : > { %833 = vmatprep.subr.bf16.mxu0 %v920_v24 }
  0x1d   : > { %854 = vmatpush3.bf16.msra.mxu1 %v919_v23 }
  0x1e   : > { %855 = vmatprep.subr.bf16.mxu1 %v922_v26 }
  0x1f   : > { %834 = vmatpush3.bf16.msra.mxu0 %v921_v25 }
  0x20   : > { %835 = vmatprep.subr.bf16.mxu0 %v924_v28 }
  0x21   : > { %856 = vmatpush3.bf16.msra.mxu1 %v923_v27 }
  0x22   : > { %857 = vmatprep.subr.bf16.mxu1 %v926_v30 }
  0x23   : > { %836 = vmatpush3.bf16.msra.mxu0 %v925_v29 }
  0x24   : > { %865 = vmatprep.subr.bf16.mxu0 %v928_v38 }
  0x25   : > { %858 = vmatpush3.bf16.msra.mxu1 %v927_v34 }
  0x26   : > { %614 = vmatmul.mubr.bf16.vlgmr.msra.gmra.mrb[0].mxu0 %v184_v37 }
  0x27   : > { %866 = vmatpush3.bf16.msra.mxu0 %v929_v42  ;;  %695 = vmatprep.mubr.bf16.mxu0 %v189_v57 }
  0x28   : > { %655 = vmatmul.mubr.bf16.vlgmr.msra.gmra.mrb[0].mxu1 %v186_v45  ;;  %867 = vmatprep.subr.bf16.mxu0 %v930_v46 }
  0x2b   : > { %868 = vmatpush3.bf16.msra.mxu0 %v931_v47 }
  0x2c   : > { %869 = vmatprep.subr.bf16.mxu0 %v932_v48 }
  0x2f   : > { %870 = vmatpush3.bf16.msra.mxu0 %v933_v49 }
  0x30   : > { %871 = vmatprep.subr.bf16.mxu0 %v934_v50 }
  0x33   : > { %872 = vmatpush3.bf16.msra.mxu0 %v935_v51 }
  0x34   : > { %873 = vmatprep.subr.bf16.mxu0 %v936_v52 }
  0x37   : > { %874 = vmatpush3.bf16.msra.mxu0 %v937_v53 }
  0x38   : > { %875 = vmatprep.subr.bf16.mxu0 %v938_v54 }
  0x3b   : > { %876 = vmatpush3.bf16.msra.mxu0 %v939_v58 }
  0x3c   : > { %877 = vmatprep.subr.bf16.mxu0 %v940_v59 }
  0x3f   : > { %878 = vmatpush3.bf16.msra.mxu0 %v941_v60 }
  0x40   : > { %879 = vmatprep.subr.bf16.mxu0 %v942_v61 }
  0x43   : > { %880 = vmatpush3.bf16.msra.mxu0 %v943_v62 }
  0x46   : > { %696 = vmatmul.mubr.bf16.vlgmr.msra.gmra.mrb[4].mxu0 %v188_v1 }
  0xf9   : > { %v837_v2 = vpop.f32.mrb[0].mxu0 }
  0xfa   : > { %v838_v4 = vpop.f32.mrb[1].mxu0 }
  0xfb   : > { %v839_v5 = vadd.f32 %v838_v4, %v837_v2  ;;  %v840_v6 = vpop.f32.mrb[2].mxu0  ;;  %v859_v7 = vpop.f32.mrb[0].mxu1 }
  0xfc   : > { %v841_v8 = vpop.f32.mrb[3].mxu0  ;;  %v860_v11 = vpop.f32.mrb[1].mxu1 }
  0xfd   : > { %v616_v9 = vadd.f32 %v839_v5, %v769_v3  ;;  %v842_v10 = vadd.f32 %v841_v8, %v840_v6  ;;  %v861_v12 = vadd.f32 %v860_v11, %v859_v7  ;;  %v862_v13 = vpop.f32.mrb[2].mxu1 }
  0xfe   : > { %v863_v15 = vpop.f32.mrb[3].mxu1 }
  0xff   : > { %v619_v14 = vadd.f32 %v842_v10, %v769_v3  ;;  %v657_v16 = vadd.f32 %v861_v12, %v616_v9  ;;  %v864_v17 = vadd.f32 %v863_v15, %v862_v13 }
 0x101   : > { %v660_v18 = vadd.f32 %v864_v17, %v619_v14 }
 0x119   : > { %v881_v19 = vpop.f32.mrb[4].mxu0 }
 0x11a   : > { %v882_v20 = vpop.f32.mrb[5].mxu0 }
 0x11b   : > { %v883_v21 = vadd.f32 %v882_v20, %v881_v19  ;;  %v884_v22 = vpop.f32.mrb[6].mxu0 }
 0x11c   : > { %v885_v23 = vpop.f32.mrb[7].mxu0 }
 0x11d   : > { %v698_v24 = vadd.f32 %v883_v21, %v657_v16  ;;  %v886_v25 = vadd.f32 %v885_v23, %v884_v22 }
 0x11f   : > { %704 = vst [vmem:[%s170_s19] sm:$0xff] %v698_v24  ;;  %v701_v26 = vadd.f32 %v886_v25, %v660_v18 }
 0x121   : > { %705 = vst [vmem:[%s170_s19 + $0x8] sm:$0xff] %v701_v26 }
 0x122 PF: > { %s13_s12 = sadd.s32 1, %s950_s12  }
 0x123   : > { %p10_p4 = scmp.ge.s32.totalorder %s13_s12, 4  }
 0x125   :  { %12 = sbr.rel (!%p10_p4) target bundleno = 1 (0x1), region = 62 }

// kernel: vit_forward.7
= control target key start
LH: loop header
LB: loop body
LE: loop exit
PB: predicated region body
PF: predicated region fallthrough
CT: control target
= control target key end

     0   :  { %vm25_vm0 = vcmask 1041408   ;;  %s341_s0 = inlined_call_operand.vmem [shape: f32[2,128], index: 0, kind: input, shape index: {}]   ;;  %s342_s1 = inlined_call_operand.vmem [shape: f32[1,128], index: 1, kind: input, shape index: {}]   ;;  %s343_s2 = inlined_call_operand.vmem [shape: f32[1,128], index: 2, kind: input, shape index: {}]   ;;  %s344_s3 = inlined_call_operand.vmem [shape: bf16[128,128], index: 3, kind: input, shape index: {}]   ;;  %s345_s4 = inlined_call_operand.vmem [shape: f32[1,128], index: 4, kind: input, shape index: {}]   ;;  %s346_s5 = inlined_call_operand.hbm [shape: f32[2,128], index: 5, kind: output, shape index: {}]  }
   0x1   :  { %v22_v0 = vld [vmem:[%s341_s0] sm:$0x3] }
   0x2   :  { %v26_v1 = vsel %vm25_vm0, %v22_v0, 0.0 }
   0x3   :  { %27 = vadd.xlane.f32.xlu0 %v26_v1 }
   0x4   :  { %10 = vsyncpa [#allocation3], 0  ;;  %v224_v2 = vld [vmem:[%s344_s3] sm:$0xff]   ;;  %v258_v3 = vmov 0.0   ;;  %v225_v4 = vld [vmem:[%s344_s3 + $0x8] sm:$0xff]   ;;  %vm259_vm1 = vmmov 0  }
   0x5   :  { %201 = vmatprep.subr.bf16.mxu0 %v258_v3  ;;  %v226_v10 = vld [vmem:[%s344_s3 + $0x10] sm:$0xff]   ;;  %v227_v11 = vld [vmem:[%s344_s3 + $0x18] sm:$0xff]   ;;  %v228_v12 = vld [vmem:[%s344_s3 + $0x20] sm:$0xff]   ;;  %217 = vmatprep.mubr.msk.bf16.mxu0 %vm259_vm1, %v258_v3  ;;  %s260_s15 = smov [#allocation2]  }
   0x6   :  { %202 = vmatpush3.bf16.msra.mxu0 %v224_v2  ;;  %v229_v13 = vld [vmem:[%s344_s3 + $0x28] sm:$0xff]   ;;  %v230_v14 = vld [vmem:[%s344_s3 + $0x30] sm:$0xff]   ;;  %v231_v15 = vld [vmem:[%s344_s3 + $0x38] sm:$0xff]   ;;  %s173_s16 = sshll.u32 %s260_s15, 4  ;;  %s174_s16 = int_to_ptr.vmem [resolvable:$true] %s173_s16 }
   0x7   :  { %203 = vmatprep.subr.bf16.mxu0 %v258_v3  ;;  %v181_v20 = vld [vmem:[%s342_s1] ss:$0 sm:$0xff]  ;;  %s234_s1 = scalar_lea.vmem %s174_s16, 32  ;;  %p239_p1 = scmp.lt.s32.totalorder %s174_s16, %s174_s16 }
   0x8   :  { %v182_v22 = vld [vmem:[%s343_s2] ss:$0 sm:$0xff]  ;;  %p235_p0 = scmp.ne.s32.totalorder %s174_s16, %s234_s1  ;;  %p240_p2 = scmp.lt.s32.totalorder %s234_s1, %s234_s1 }
   0x9   :  { %v183_v26 = vld [vmem:[%s345_s4] ss:$0 sm:$0xff] }
   0xa   :  { %204 = vmatpush3.bf16.msra.mxu0 %v225_v4  ;;  %p241_p3 = por %p240_p2, %p239_p1 }
   0xb   :  { %205 = vmatprep.subr.bf16.mxu0 %v258_v3 }
   0xc   :  { %p242_p4 = pnand %p241_p3, %p235_p0 }
   0xe   :  { %206 = vmatpush3.bf16.msra.mxu0 %v226_v10 }
   0xf   :  { %207 = vmatprep.subr.bf16.mxu0 %v258_v3 }
  0x12   :  { %208 = vmatpush3.bf16.msra.mxu0 %v227_v11 }
  0x13   :  { %209 = vmatprep.subr.bf16.mxu0 %v258_v3 }
  0x16   :  { %210 = vmatpush3.bf16.msra.mxu0 %v228_v12 }
  0x17   :  { %211 = vmatprep.subr.bf16.mxu0 %v258_v3 }
  0x1a   :  { %212 = vmatpush3.bf16.msra.mxu0 %v229_v13 }
  0x1b   :  { %213 = vmatprep.subr.bf16.mxu0 %v258_v3 }
  0x1e   :  { %214 = vmatpush3.bf16.msra.mxu0 %v230_v14 }
  0x1f   :  { %215 = vmatprep.subr.bf16.mxu0 %v258_v3 }
  0x22   :  { %216 = vmatpush3.bf16.msra.mxu0 %v231_v15 }
  0x90   :  { %v28_v5 = vpop.xlane.xlu0 %27 }
  0x91   :  { %v30_v6 = vmul.f32 0.0078125, %v28_v5 }
  0x93   :  { %v31_v7 = vsub.f32 %v22_v0, %v30_v6 }
  0x95   :  { %v32_v8 = vmul.f32 %v31_v7, %v31_v7 }
  0x97   :  { %v33_v9 = vsel %vm25_vm0, %v32_v8, 0.0 }
  0x98   :  { %34 = vadd.xlane.f32.xlu0 %v33_v9 }
 0x125   :  { %v35_v16 = vpop.xlane.xlu0 %34 }
 0x126   :  { %v36_v17 = vmul.f32 0.0078125, %v35_v16 }
 0x128   :  { %v37_v18 = vadd.f32 1e-06, %v36_v17 }
 0x12a   :  { %232 = vrsqrt.f32 %v37_v18 }
 0x134   :  { %v233_v19 = vpop.eup %232 }
 0x135   :  { %v39_v21 = vmul.f32 %v233_v19, %v31_v7 }
 0x137   :  { %v46_v23 = vmul.f32 %v181_v20, %v39_v21 }
 0x139   :  { %v53_v24 = vadd.f32 %v182_v22, %v46_v23 }
 0x13b   :  { %v54_v25 = vpack.c.bf16 %v53_v24, %v53_v24 }
 0x13d   :  { %218 = vmatmul.mubr.bf16.vlgmr.msra.gmra.mrb[0].mxu0 %v54_v25 }
 0x210   :  { %v160_v27 = vpop.f32.mrb[0].mxu0 }
 0x211   :  { %v161_v28 = vadd.f32 %v183_v26, %v160_v27  ;;  %v219_v29 = vpop.f32.mrb[1].mxu0 }
 0x212   :  { %v163_v30 = vpop.f32.mrb[2].mxu0 }
 0x213   :  { %166 = vst [vmem:[#allocation2] sm:$0x3] %v161_v28  ;;  %v220_v31 = vpop.f32.mrb[3].mxu0 }
 0x214   :  { %245 = shalt.err (!%p242_p4)
}
 0x215   :  { %s246_s4 = scalar_lea.hbm %s346_s5, 32 }
 0x216   :  { %p247_p5 = scmp.ne.s32.totalorder %s346_s5, %s246_s4  ;;  %p250_p6 = scmp.lt.u32.totalorder %s246_s4, %s346_s5 }
 0x218   :  { %p252_p7 = pnand %p250_p6, %p247_p5 }
 0x21a   :  { %255 = shalt.err (!%p252_p7)
}
 0x21b   :  { %176 = dma.vmem_to_hbm [thread:$0]  %s174_s16, 32, %s346_s5, [#allocation3]  }
 0x21c   :  { %256 = dma.done.wait [#allocation3], 32  }
 0x21d   :  { %257 = vsyncadd [#allocation3], 4294967264 }
 0x21e   :  { %180 = vsyncpa [#allocation3], 1 }

// kernel: vit_forward.5
= control target key start
LH: loop header
LB: loop body
LE: loop exit
PB: predicated region body
PF: predicated region fallthrough
CT: control target
= control target key end

     0   :  { %s3578_s25 = smov 0   ;;  %s4365_s0 = inlined_call_operand.vmem [shape: f32[2,17,128], index: 0, kind: input, shape index: {}]   ;;  %s4366_s1 = inlined_call_operand.vmem [shape: f32[1,128], index: 1, kind: input, shape index: {}]   ;;  %s4367_s2 = inlined_call_operand.vmem [shape: f32[1,128], index: 2, kind: input, shape index: {}]   ;;  %s4368_s3 = inlined_call_operand.vmem [shape: bf16[128,384], index: 3, kind: input, shape index: {}]   ;;  %s4369_s4 = inlined_call_operand.vmem [shape: f32[1,384], index: 4, kind: input, shape index: {}]   ;;  %s4370_s5 = inlined_call_operand.vmem [shape: bf16[128,128], index: 5, kind: input, shape index: {}]   ;;  %s4371_s6 = inlined_call_operand.vmem [shape: f32[1,128], index: 6, kind: input, shape index: {}]   ;;  %s4372_s7 = inlined_call_operand.vmem [shape: f32[1,128], index: 7, kind: input, shape index: {}]   ;;  %s4373_s8 = inlined_call_operand.vmem [shape: f32[1,128], index: 8, kind: input, shape index: {}]   ;;  %s4374_s9 = inlined_call_operand.vmem [shape: bf16[128,512], index: 9, kind: input, shape index: {}]   ;;  %s4375_s10 = inlined_call_operand.vmem [shape: f32[1,512], index: 10, kind: input, shape index: {}]   ;;  %s4376_s11 = inlined_call_operand.vmem [shape: bf16[512,128], index: 11, kind: input, shape index: {}]   ;;  %s4377_s12 = inlined_call_operand.vmem [shape: f32[1,128], index: 12, kind: input, shape index: {}]   ;;  %s4378_s13 = inlined_call_operand.vmem [shape: f32[2,17,128], index: 13, kind: output, shape index: {}]  }
   0x1 LB: > { %s2879_s26 = sadd.s32 4294967295, %s3502_s25   ;;  %p2883_p0 = scmp.ge.s32.totalorder %s3502_s25, 1  ;;  %s3502_s25 = sphi %s3578_s25, %s23_s25  }
   0x2   : > { %p387_p1 = scmp.lt.s32.totalorder %s3502_s25, 3 }
   0x4   : > { %p388_p2 = pnand %p2883_p0, %p387_p1 }
   0x5   : > { %p431_p3 = scmp.lt.s32.totalorder (!%p388_p2), %s2879_s26, 1  ;;  %vm451_vm0 = vcmask (!%p388_p2), 1040384   ;;  %v3265_v4 = vld [vmem:[%s4368_s3 + $0x4] ss:$12 sps:$4 sm:$0xff] (!%p388_p2)   ;;  %v3267_v5 = vld [vmem:[%s4368_s3] ss:$12 sps:$4 sm:$0xff] (!%p388_p2)  }
   0x6   : > { %391 = sbr.rel (%p388_p2) target bundleno = 3943 (0xf67), region = 72  ;;  %v3268_v6 = vld [vmem:[%s4368_s3 + $0x8] ss:$12 sps:$4 sm:$0xff] (!%p388_p2)   ;;  %681 = vmatprep.subr.bf16.mxu0 (!%p388_p2), %v3265_v4  ;;  %v3271_v21 = vld [vmem:[%s4368_s3 + $0x18] ss:$12 sps:$4 sm:$0xff] (!%p388_p2)   ;;  %v3504_v37 = vmov (!%p388_p2), 0  }
   0x7   : > { %v3269_v7 = vld [vmem:[%s4368_s3 + $0x1c] ss:$12 sps:$4 sm:$0xff] (!%p388_p2)   ;;  %3128 = vmatprep.subr.bf16.mxu1 (!%p388_p2), %v3268_v6  ;;  %682 = vmatpush1.bf16.msra.mxu0 (!%p388_p2), %v3267_v5  ;;  %v3272_v22 = vld [vmem:[%s4368_s3 + $0x20] ss:$12 sps:$4 sm:$0xff] (!%p388_p2)   ;;  %v3276_v25 = vld [vmem:[%s4368_s3 + $0x38] ss:$12 sps:$4 sm:$0xff] (!%p388_p2)  }
   0x8   : > { %3129 = vmatpush3.bf16.msra.mxu1 (!%p388_p2), %v3268_v6  ;;  %683 = vmatprep.subr.bf16.mxu0 (!%p388_p2), %v3269_v7  ;;  %v3273_v23 = vld [vmem:[%s4368_s3 + $0x34] ss:$12 sps:$4 sm:$0xff] (!%p388_p2)   ;;  %v3275_v24 = vld [vmem:[%s4368_s3 + $0x30] ss:$12 sps:$4 sm:$0xff] (!%p388_p2)   ;;  %v3277_v26 = vld [vmem:[%s4368_s3 + $0x4c] ss:$12 sps:$4 sm:$0xff] (!%p388_p2)  }
   0x9   : > { %3130 = vmatprep.subr.bf16.mxu1 (!%p388_p2), %v3272_v22  ;;  %v3279_v27 = vld [vmem:[%s4368_s3 + $0x48] ss:$12 sps:$4 sm:$0xff] (!%p388_p2)   ;;  %v3280_v28 = vld [vmem:[%s4368_s3 + $0x50] ss:$12 sps:$4 sm:$0xff] (!%p388_p2)   ;;  %v3283_v30 = vld [vmem:[%s4368_s3 + $0x60] ss:$12 sps:$4 sm:$0xff] (!%p388_p2)   ;;  %713 = vmatprep.mubr.bf16.mxu0 (!%p388_p2), %v3504_v37 }
   0xa   : > { %v3281_v29 = vld [vmem:[%s4368_s3 + $0x64] ss:$12 sps:$4 sm:$0xff] (!%p388_p2)   ;;  %v3284_v31 = vld [vmem:[%s4368_s3 + $0x68] ss:$12 sps:$4 sm:$0xff] (!%p388_p2)   ;;  %v3288_v33 = vld [vmem:[%s4368_s3 + $0x80] ss:$12 sps:$4 sm:$0xff] (!%p388_p2)  }
   0xb   : > { %684 = vmatpush1.bf16.msra.mxu0 (!%p388_p2), %v3271_v21  ;;  %v3285_v32 = vld [vmem:[%s4368_s3 + $0x7c] ss:$12 sps:$4 sm:$0xff] (!%p388_p2)   ;;  %v3287_v34 = vld [vmem:[%s4368_s3 + $0x78] ss:$12 sps:$4 sm:$0xff] (!%p388_p2)   ;;  %v3289_v35 = vld [vmem:[%s4368_s3 + $0x94] ss:$12 sps:$4 sm:$0xff] (!%p388_p2)  }
   0xc   : > { %3131 = vmatpush3.bf16.msra.mxu1 (!%p388_p2), %v3272_v22  ;;  %685 = vmatprep.subr.bf16.mxu0 (!%p388_p2), %v3273_v23  ;;  %v3292_v36 = vld [vmem:[%s4368_s3 + $0x98] ss:$12 sps:$4 sm:$0xff] (!%p388_p2)   ;;  %v3291_v38 = vld [vmem:[%s4368_s3 + $0x90] ss:$12 sps:$4 sm:$0xff] (!%p388_p2)   ;;  %v3295_v41 = vld [vmem:[%s4368_s3 + $0xa8] ss:$12 sps:$4 sm:$0xff] (!%p388_p2)  }
   0xd   : > { %s4380_s26 = smov (!%p431_p3, %s2879_s26), 1  ;;  %3132 = vmatprep.subr.bf16.mxu1 %v3276_v25  ;;  %v3293_v39 = vld [vmem:[%s4368_s3 + $0xac] ss:$12 sps:$4 sm:$0xff]   ;;  %v3296_v40 = vld [vmem:[%s4368_s3 + $0xb0] ss:$12 sps:$4 sm:$0xff]   ;;  %vm789_vm1 = vcmask 261120  }
   0xe   : > { %s3252_s27 = smul.u32 24, %s4380_s26  ;;  %v2886_v53 = vld [vmem:[%s4366_s1] ss:$0 sm:$0xff]  ;;  %vm850_vm2 = vcmask 138240   ;;  %vm857_vm3 = vcmask 131072   ;;  %s3505_s16 = smov 96  }
   0xf   : > { %686 = vmatpush1.bf16.msra.mxu0 %v3275_v24  ;;  %v2887_v59 = vld [vmem:[%s4367_s2] ss:$0 sm:$0xff]  ;;  %s3506_s21 = smov 64   ;;  %s3507_s22 = smov 32  }
  0x10   : > { %s3594_s30 = scalar_lea.vmem %s4365_s0, %s3252_s27  ;;  %3133 = vmatpush3.bf16.msra.mxu1 %v3276_v25  ;;  %687 = vmatprep.subr.bf16.mxu0 %v3277_v26  ;;  %v536_v6 = vld [vmem:[%s4369_s4] sm:$0x7] }
  0x11   : > { %v442_v0 = vld [vmem:[%s3594_s30] sm:$0xff]  ;;  %v444_v1 = vld [vmem:[%s3594_s30 + $0x10] sm:$0x1]  ;;  %v443_v2 = vld [vmem:[%s3594_s30 + $0x8] sm:$0xff]  ;;  %3134 = vmatprep.subr.bf16.mxu1 %v3280_v28 }
  0x12   : > { %447 = vadd.xlane.f32.xlu0 %v442_v0  ;;  %v452_v3 = vsel %vm451_vm0, %v444_v1, 0.0 }
  0x13   : > { %453 = vadd.xlane.f32.xlu1 %v452_v3  ;;  %688 = vmatpush1.bf16.msra.mxu0 %v3279_v27  ;;  %v538_v3 = vlaneseq }
  0x14   : > { %3135 = vmatpush3.bf16.msra.mxu1 %v3280_v28  ;;  %689 = vmatprep.subr.bf16.mxu0 %v3281_v29 }
  0x15   : > { %3136 = vmatprep.subr.bf16.mxu1 %v3284_v31  ;;  %v3696_v4 = vshrl.u32 %v538_v3, 7 }
  0x16   : > { %449 = vadd.xlane.f32.xlu0 %v443_v2 }
  0x17   : > { %690 = vmatpush1.bf16.msra.mxu0 %v3283_v30  ;;  %v540_v5 = vsub.s32 0, %v3696_v4  ;;  %v548_v7 = vsub.s32 2, %v3696_v4 }
  0x18   : > { %3137 = vmatpush3.bf16.msra.mxu1 %v3284_v31  ;;  %691 = vmatprep.subr.bf16.mxu0 %v3285_v32 }
  0x19   : > { %3138 = vmatprep.subr.bf16.mxu1 %v3288_v33 }
  0x1b   : > { %692 = vmatpush1.bf16.msra.mxu0 %v3287_v34 }
  0x1c   : > { %3139 = vmatpush3.bf16.msra.mxu1 %v3288_v33  ;;  %693 = vmatprep.subr.bf16.mxu0 %v3289_v35  ;;  %v3720_v33 = vsel %vm451_vm0, 65535, %v3504_v37 }
  0x1d   : > { %3140 = vmatprep.subr.bf16.mxu1 %v3292_v36 }
  0x1f   : > { %694 = vmatpush1.bf16.msra.mxu0 %v3291_v38 }
  0x20   : > { %3141 = vmatpush3.bf16.msra.mxu1 %v3292_v36  ;;  %695 = vmatprep.subr.bf16.mxu0 %v3293_v39 }
  0x21   : > { %3142 = vmatprep.subr.bf16.mxu1 %v3296_v40 }
  0x23   : > { %696 = vmatpush1.bf16.msra.mxu0 %v3295_v41 }
  0x24   : > { %3143 = vmatpush3.bf16.msra.mxu1 %v3296_v40 }
  0x9f   : > { %v448_v8 = vpop.xlane.xlu0 %447 }
  0xa0   : > { %v456_v9 = vmul.f32 0.0078125, %v448_v8  ;;  %v454_v10 = vpop.xlane.xlu1 %453  ;;  %v544_v8 = vsub.s32 1, %v3696_v4 }
  0xa1   : > { %v458_v11 = vmul.f32 0.0078125, %v454_v10  ;;  %v549_v10 = vrot.slane %v536_v6, %v548_v7 }
  0xa2   : > { %v3612_v12 = vsub.f32 %v442_v0, %v456_v9  ;;  %v541_v9 = vrot.slane %v536_v6, %v540_v5 }
  0xa3   : > { %v3614_v13 = vsub.f32 %v444_v1, %v458_v11  ;;  %v450_v14 = vpop.xlane.xlu0 %449 }
  0xa4   : > { %v457_v15 = vmul.f32 0.0078125, %v450_v14  ;;  %v462_v16 = vmul.f32 %v3612_v12, %v3612_v12 }
  0xa5   : > { %v464_v17 = vmul.f32 %v3614_v13, %v3614_v13 }
  0xa6   : > { %v3620_v18 = vsub.f32 %v443_v2, %v457_v15  ;;  %465 = vadd.xlane.f32.xlu1 %v462_v16 }
  0xa7   : > { %v469_v19 = vsel %vm451_vm0, %v464_v17, 0.0 }
  0xa8   : > { %v463_v20 = vmul.f32 %v3620_v18, %v3620_v18 }
  0xaa   : > { %470 = vadd.xlane.f32.xlu1 %v469_v19  ;;  %467 = vadd.xlane.f32.xlu0 %v463_v20 }
 0x133   : > { %v466_v42 = vpop.xlane.xlu1 %465 }
 0x134   : > { %v472_v43 = vmul.f32 0.0078125, %v466_v42 }
 0x136   : > { %v475_v44 = vadd.f32 1e-06, %v472_v43 }
 0x137   : > { %v471_v45 = vpop.xlane.xlu1 %470  ;;  %v468_v46 = vpop.xlane.xlu0 %467 }
 0x138   : > { %3385 = vrsqrt.f32 %v475_v44  ;;  %v474_v47 = vmul.f32 0.0078125, %v471_v45  ;;  %v473_v48 = vmul.f32 0.0078125, %v468_v46 }
 0x13a   : > { %v477_v49 = vadd.f32 1e-06, %v474_v47  ;;  %v476_v50 = vadd.f32 1e-06, %v473_v48 }
 0x13c   : > { %3387 = vrsqrt.f32 %v477_v49 }
 0x13d   : > { %3389 = vrsqrt.f32 %v476_v50 }
 0x142   : > { %v3386_v51 = vpop.eup %3385 }
 0x143   : > { %v481_v52 = vmul.f32 %v3386_v51, %v3612_v12  ;;  %v545_v12 = vrot.slane %v536_v6, %v544_v8 }
 0x145   : > { %v490_v58 = vmul.f32 %v2886_v53, %v481_v52 }
 0x146   : > { %v3388_v54 = vpop.eup %3387 }
 0x147   : > { %v3390_v55 = vpop.eup %3389  ;;  %v483_v56 = vmul.f32 %v3388_v54, %v3614_v13  ;;  %v499_v63 = vadd.f32 %v2887_v59, %v490_v58 }
 0x148   : > { %v482_v57 = vmul.f32 %v3390_v55, %v3620_v18 }
 0x149   : > { %v492_v60 = vmul.f32 %v2886_v53, %v483_v56 }
 0x14a   : > { %v491_v61 = vmul.f32 %v2886_v53, %v482_v57 }
 0x14b   : > { %v501_v62 = vadd.f32 %v2887_v59, %v492_v60 }
 0x14c   : > { %v500_v0 = vadd.f32 %v2887_v59, %v491_v61 }
 0x14d   : > { %v503_v1 = vpack.c.bf16 %v501_v62, %v501_v62 }
 0x14e   : > { %v502_v2 = vpack.c.bf16 %v500_v0, %v499_v63 }
 0x150   : > { %714 = vmatmul.mubr.bf16.vlgmr.msra.gmra.mrb[0].mxu0 %v502_v2  ;;  %3144 = vmatprep.mubr.bf16.mxu1 %v502_v2 }
 0x151   : > { %3145 = vmatmul.mubr.bf16.vlgmr.msra.gmra.mrb[0].mxu1 %v503_v1  ;;  %723 = vmatprep.mubr.bf16.mxu0 %v3504_v37 }
 0x158   : > { %724 = vmatmul.mubr.bf16.gmra.mrb[4].mxu0 %v503_v1 }
 0x223   : > { %v715_v11 = vpop.f32.mrb[0].mxu0 }
 0x224   : > { %v716_v13 = vadd.f32 %v715_v11, %v541_v9  ;;  %v717_v14 = vpop.f32.mrb[1].mxu0  ;;  %v3146_v15 = vpop.f32.mrb[0].mxu1 }
 0x225   : > { %v775_v16 = vadd.f32 %v3146_v15, %v549_v10  ;;  %v719_v17 = vpop.f32.mrb[2].mxu0  ;;  %v766_v18 = vpop.f32.mrb[1].mxu1  ;;  %v718_v22 = vadd.f32 %v717_v14, %v545_v12 }
 0x226   : > { %v720_v19 = vadd.f32 %v719_v17, %v541_v9  ;;  %v721_v20 = vpop.f32.mrb[3].mxu0  ;;  %v3147_v21 = vpop.f32.mrb[2].mxu1  ;;  %v780_v25 = vmul.f32 0.17677669, %v716_v13  ;;  %v767_v27 = vadd.f32 %v766_v18, %v549_v10 }
 0x227   : > { %v722_v23 = vadd.f32 %v721_v20, %v545_v12  ;;  %v769_v24 = vpop.f32.mrb[3].mxu1  ;;  %v3710_v29 = vpack.c.bf16 %v775_v16, %v775_v16 }
 0x228   : > { %v781_v26 = vmul.f32 0.17677669, %v720_v19  ;;  %v770_v28 = vadd.f32 %v769_v24, %v549_v10  ;;  %v3297_v24 = vld [vmem:[%s4370_s5] sm:$0xff]  }
 0x229   : > { %v3712_v30 = vpack.c.bf16 %v722_v23, %v718_v22  ;;  %v896_v40 = vand.u32 %v3720_v33, %v3710_v29 }
 0x22a   : > { %v3714_v31 = vpack.c.bf16 %v781_v26, %v780_v25  ;;  %v3716_v32 = vpack.c.bf16 %v770_v28, %v767_v27  ;;  %v3298_v27 = vld [vmem:[%s4370_s5 + $0x8] sm:$0xff]  }
 0x22b   : > { %v725_v34 = vpop.f32.mrb[4].mxu0  ;;  %3244 = vmatprep.subr.msk.bf16.mxu0 %vm789_vm1, %v3712_v30  ;;  %v797_v35 = vsel %vm789_vm1, %v3712_v30, 0 }
 0x22c   : > { %v727_v36 = vpop.f32.mrb[5].mxu0  ;;  %3149 = vmatpush3.bf16.xpose.msra.mxu0 %v797_v35  ;;  %3152 = vmatprep.mubr.msk.bf16.mxu0 %vm789_vm1, %v3714_v31  ;;  %v726_v43 = vadd.f32 %v725_v34, %v541_v9 }
 0x22d   : > { %v728_v38 = vadd.f32 %v727_v36, %v545_v12  ;;  %3156 = vmatprep.subr.bf16.mxu1 %v3716_v32  ;;  %v729_v39 = vpop.f32.mrb[6].mxu0 }
 0x22e   : > { %3157 = vmatpush3.bf16.msra.mxu1 %v3716_v32  ;;  %v730_v41 = vpop.f32.mrb[7].mxu0  ;;  %v782_v45 = vmul.f32 0.17677669, %v726_v43 }
 0x22f   : > { %v3732_v42 = vpack.c.bf16 %v728_v38, %v728_v38  ;;  %3158 = vmatprep.subr.bf16.mxu1 %v896_v40 }
 0x230   : > { %v3738_v46 = vpack.c.bf16 %v782_v45, %v782_v45 }
 0x231   : > { %3245 = vmatprep.subr.msk.bf16.mxu0 %vm789_vm1, %v3732_v42  ;;  %v800_v44 = vsel %vm789_vm1, %v3732_v42, 0 }
 0x232   : > { %3159 = vmatpush3.bf16.msra.mxu1 %v896_v40 }
 0x234   : > { %3151 = vmatpush3.bf16.xpose.msra.mxu0 %v800_v44 }
 0x23b   : > { %3153 = vmatmul.mubr.msk.bf16.vlgmr.msra.gmra.mrb[8].mxu0 %vm789_vm1, %v3738_v46 }
 0x30e   : > { %v3154_v47 = vpop.f32.mrb[8].mxu0 }
 0x30f   : > { %v836_v48 = vpop.f32.mrb[9].mxu0  ;;  %v858_v53 = vsel %vm857_vm3, %v3154_v47, -inf }
 0x310   : > { %v3155_v49 = vpop.f32.mrb[10].mxu0  ;;  %v851_v50 = vsel %vm850_vm2, %v836_v48, -inf }
 0x311   : > { %852 = vmax.xlane.f32.xlu0 %v851_v50  ;;  %v839_v51 = vpop.f32.mrb[11].mxu0 }
 0x312   : > { %v854_v52 = vsel %vm850_vm2, %v839_v51, -inf }
 0x313   : > { %855 = vmax.xlane.f32.xlu1 %v854_v52 }
 0x315   : > { %859 = vmax.xlane.f32.xlu0 %v858_v53 }
 0x39e   : > { %v853_v54 = vpop.xlane.xlu0 %852 }
 0x39f   : > { %v861_v55 = vsub.f32 %v836_v48, %v853_v54 }
 0x3a0   : > { %v856_v56 = vpop.xlane.xlu1 %855 }
 0x3a1   : > { %v864_v57 = vmul.f32 1.442695, %v861_v55  ;;  %v862_v58 = vsub.f32 %v839_v51, %v856_v56 }
 0x3a2   : > { %v860_v59 = vpop.xlane.xlu0 %859 }
 0x3a3   : > { %3391 = vpow2.f32 %v864_v57  ;;  %v866_v60 = vmul.f32 1.442695, %v862_v58  ;;  %v863_v61 = vsub.f32 %v3154_v47, %v860_v59 }
 0x3a5   : > { %3393 = vpow2.f32 %v866_v60  ;;  %v868_v62 = vmul.f32 1.442695, %v863_v61 }
 0x3a7   : > { %3395 = vpow2.f32 %v868_v62 }
 0x3ad   : > { %v3392_v63 = vpop.eup %3391 }
 0x3ae   : > { %v870_v0 = vsel %vm850_vm2, %v3392_v63, 0.0 }
 0x3af   : > { %v3394_v1 = vpop.eup %3393  ;;  %871 = vadd.xlane.f32.xlu1 %v870_v0 }
 0x3b0   : > { %v873_v2 = vsel %vm850_vm2, %v3394_v1, 0.0 }
 0x3b1   : > { %v3396_v3 = vpop.eup %3395  ;;  %874 = vadd.xlane.f32.xlu0 %v873_v2 }
 0x3b2   : > { %v876_v6 = vsel %vm857_vm3, %v3396_v3, 0.0 }
 0x3b3   : > { %877 = vadd.xlane.f32.xlu1 %v876_v6 }
 0x3c4   : > { %962 = vrot.lane.b32.xlu1 %v3732_v42, %s3505_s16 }
 0x3c7   : > { %960 = vrot.lane.b32.xlu0 %v3712_v30, %s3505_s16 }
 0x3c8   : > { %954 = vrot.lane.b32.xlu1 %v3714_v31, %s3505_s16 }
 0x3cc   : > { %956 = vrot.lane.b32.xlu1 %v3738_v46, %s3505_s16 }
 0x43c   : > { %v872_v9 = vpop.xlane.xlu1 %871 }
 0x43d   : > { %3397 = vrcp.f32 %v872_v9 }
 0x43e   : > { %v875_v10 = vpop.xlane.xlu0 %874 }
 0x43f   : > { %3399 = vrcp.f32 %v875_v10 }
 0x440   : > { %v878_v11 = vpop.xlane.xlu1 %877 }
 0x441   : > { %3401 = vrcp.f32 %v878_v11 }
 0x442   : > { %v961_v12 = vpop.permute.xlu0 %960 }
 0x443   : > { %3246 = vmatprep.subr.msk.bf16.mxu1 %vm789_vm1, %v961_v12  ;;  %v971_v22 = vsel %vm789_vm1, %v961_v12, 0 }
 0x444   : > { %v963_v15 = vpop.permute.xlu1 %962 }
 0x445   : > { %v974_v25 = vsel %vm789_vm1, %v963_v15, 0 }
 0x447   : > { %v3398_v13 = vpop.eup %3397 }
 0x448   : > { %v882_v16 = vmul.f32 %v3398_v13, %v3392_v63  ;;  %v955_v23 = vpop.permute.xlu1 %954 }
 0x449   : > { %v3400_v14 = vpop.eup %3399 }
 0x44a   : > { %v883_v17 = vmul.f32 %v3400_v14, %v3394_v1 }
 0x44b   : > { %v3402_v18 = vpop.eup %3401 }
 0x44c   : > { %v884_v19 = vmul.f32 %v3402_v18, %v3396_v3  ;;  %v885_v20 = vpack.c.bf16 %v883_v17, %v882_v16  ;;  %v957_v26 = vpop.permute.xlu1 %956 }
 0x44e   : > { %3160 = vmatprep.mubr.msk.bf16.mxu1 %vm850_vm2, %v885_v20  ;;  %v886_v21 = vpack.c.bf16 %v884_v19, %v884_v19  ;;  %v3300_v19 = vld [vmem:[%s4370_s5 + $0x18] sm:$0xff]  }
 0x450   : > { %3161 = vmatmul.mubr.msk.bf16.vlgmr.msra.gmra.mrb[4].mxu1 %vm850_vm2, %v886_v21 }
 0x451   : > { %3165 = vmatpush3.bf16.xpose.msra.mxu1 %v971_v22  ;;  %3168 = vmatprep.mubr.msk.bf16.mxu1 %vm789_vm1, %v955_v23 }
 0x452   : > { %3247 = vmatprep.subr.msk.bf16.mxu1 %vm789_vm1, %v963_v15 }
 0x459   : > { %3167 = vmatpush3.bf16.xpose.msra.mxu1 %v974_v25 }
 0x45a   : > { %3188 = vmatprep.subr.bf16.mxu1 %v3297_v24 }
 0x460   : > { %3169 = vmatmul.mubr.msk.bf16.vlgmr.msra.gmra.mrb[8].mxu1 %vm789_vm1, %v957_v26 }
 0x461   : > { %3189 = vmatpush3.bf16.msra.mxu1 %v3297_v24 }
 0x462   : > { %3190 = vmatprep.subr.bf16.mxu1 %v3298_v27 }
 0x465   : > { %3191 = vmatpush3.bf16.msra.mxu1 %v3298_v27 }
 0x523   : > { %v3162_v28 = vpop.f32.mrb[4].mxu1 }
 0x524   : > { %v932_v34 = vpop.f32.mrb[5].mxu1  ;;  %v947_v39 = vpack.c.bf16 %v3162_v28, %v3162_v28 }
 0x525   : > { %v3163_v35 = vpop.f32.mrb[6].mxu1 }
 0x526   : > { %v935_v36 = vpop.f32.mrb[7].mxu1 }
 0x527   : > { %v946_v38 = vpack.c.bf16 %v935_v36, %v932_v34 }
 0x529   : > { %3192 = vmatprep.mubr.msk.bf16.mxu1 %vm789_vm1, %v946_v38 }
 0x52a   : > { %3193 = vmatmul.mubr.msk.bf16.vlgmr.msra.gmra.mrb[12].mxu1 %vm789_vm1, %v947_v39 }
 0x533   : > { %v3170_v40 = vpop.f32.mrb[8].mxu1 }
 0x534   : > { %v1010_v41 = vpop.f32.mrb[9].mxu1  ;;  %v1030_v48 = vsel %vm857_vm3, %v3170_v40, -inf }
 0x535   : > { %v3171_v43 = vpop.f32.mrb[10].mxu1  ;;  %v1024_v44 = vsel %vm850_vm2, %v1010_v41, -inf }
 0x536   : > { %1025 = vmax.xlane.f32.xlu0 %v1024_v44  ;;  %v1013_v45 = vpop.f32.mrb[11].mxu1 }
 0x537   : > { %v1027_v47 = vsel %vm850_vm2, %v1013_v45, -inf }
 0x538   : > { %1028 = vmax.xlane.f32.xlu1 %v1027_v47 }
 0x53a   : > { %1031 = vmax.xlane.f32.xlu0 %v1030_v48 }
 0x5c3   : > { %v1026_v49 = vpop.xlane.xlu0 %1025 }
 0x5c4   : > { %v1033_v50 = vsub.f32 %v1010_v41, %v1026_v49 }
 0x5c5   : > { %v1029_v51 = vpop.xlane.xlu1 %1028 }
 0x5c6   : > { %v1036_v52 = vmul.f32 1.442695, %v1033_v50  ;;  %v1034_v53 = vsub.f32 %v1013_v45, %v1029_v51 }
 0x5c7   : > { %v1032_v54 = vpop.xlane.xlu0 %1031 }
 0x5c8   : > { %3403 = vpow2.f32 %v1036_v52  ;;  %v1038_v55 = vmul.f32 1.442695, %v1034_v53  ;;  %v1035_v56 = vsub.f32 %v3170_v40, %v1032_v54 }
 0x5ca   : > { %3405 = vpow2.f32 %v1038_v55  ;;  %v1040_v57 = vmul.f32 1.442695, %v1035_v56 }
 0x5cc   : > { %3407 = vpow2.f32 %v1040_v57 }
 0x5d2   : > { %v3404_v58 = vpop.eup %3403 }
 0x5d3   : > { %v1042_v59 = vsel %vm850_vm2, %v3404_v58, 0.0 }
 0x5d4   : > { %v3406_v60 = vpop.eup %3405  ;;  %1043 = vadd.xlane.f32.xlu0 %v1042_v59 }
 0x5d5   : > { %v1045_v63 = vsel %vm850_vm2, %v3406_v60, 0.0 }
 0x5d6   : > { %v3408_v61 = vpop.eup %3407 }
 0x5d7   : > { %v1048_v62 = vsel %vm857_vm3, %v3408_v61, 0.0 }
 0x5d8   : > { %1049 = vadd.xlane.f32.xlu1 %v1048_v62  ;;  %1046 = vadd.xlane.f32.xlu0 %v1045_v63 }
 0x5e9   : > { %1063 = vrot.lane.b32.xlu1 %v3710_v29, %s3505_s16 }
 0x5ed   : > { %1265 = vrot.lane.b32.xlu1 %v3712_v30, %s3506_s21 }
 0x5ee   : > { %1061 = vrot.lane.b32.xlu0 %v3716_v32, %s3505_s16 }
 0x5f1   : > { %1267 = vrot.lane.b32.xlu1 %v3732_v42, %s3506_s21 }
 0x5f2   : > { %1261 = vrot.lane.b32.xlu0 %v3714_v31, %s3506_s21 }
 0x5f5   : > { %1263 = vrot.lane.b32.xlu1 %v3738_v46, %s3506_s21 }
 0x5f6   : > { %1505 = vrot.lane.b32.xlu0 %v3712_v30, %s3507_s22 }
 0x5f9   : > { %1507 = vrot.lane.b32.xlu1 %v3732_v42, %s3507_s22 }
 0x5fa   : > { %1501 = vrot.lane.b32.xlu0 %v3714_v31, %s3507_s22 }
 0x5fd   : > { %1503 = vrot.lane.b32.xlu1 %v3738_v46, %s3507_s22  ;;  %v3798_v0 = vpop.f32.mrb[12].mxu1  ;;  %v3299_v46 = vld [vmem:[%s4370_s5 + $0x10] sm:$0xff]  }
 0x5fe   : > { %v3800_v1 = vpop.f32.mrb[13].mxu1 }
 0x5ff   : > { %v3195_v2 = vpop.f32.mrb[14].mxu1 }
 0x600   : > { %v3802_v3 = vpop.f32.mrb[15].mxu1 }
 0x661   : > { %v1044_v6 = vpop.xlane.xlu0 %1043 }
 0x662   : > { %3409 = vrcp.f32 %v1044_v6 }
 0x665   : > { %v1047_v9 = vpop.xlane.xlu0 %1046  ;;  %v1050_v30 = vpop.xlane.xlu1 %1049 }
 0x666   : > { %3411 = vrcp.f32 %v1047_v9 }
 0x667   : > { %3413 = vrcp.f32 %v1050_v30 }
 0x669   : > { %v1062_v42 = vpop.permute.xlu0 %1061  ;;  %v1064_v10 = vpop.permute.xlu1 %1063 }
 0x66a   : > { %v1073_v31 = vand.u32 %v1064_v10, %v3720_v33  ;;  %3172 = vmatprep.subr.bf16.mxu0 %v1062_v42 }
 0x66b   : > { %3173 = vmatpush3.bf16.msra.mxu0 %v1062_v42 }
 0x66c   : > { %3174 = vmatprep.subr.bf16.mxu0 %v1073_v31  ;;  %v3410_v11 = vpop.eup %3409 }
 0x66d   : > { %v1054_v14 = vmul.f32 %v3410_v11, %v3404_v58  ;;  %v1266_v20 = vpop.permute.xlu1 %1265  ;;  %v1262_v27 = vpop.permute.xlu0 %1261 }
 0x66e   : > { %v1276_v28 = vsel %vm789_vm1, %v1266_v20, 0 }
 0x66f   : > { %3175 = vmatpush3.bf16.msra.mxu0 %v1073_v31 }
 0x670   : > { %v3412_v12 = vpop.eup %3411  ;;  %3180 = vmatprep.subr.bf16.mxu0 %v3299_v46 }
 0x671   : > { %v3414_v13 = vpop.eup %3413  ;;  %v1055_v15 = vmul.f32 %v3412_v12, %v3406_v60  ;;  %v1268_v34 = vpop.permute.xlu1 %1267 }
 0x672   : > { %v1056_v16 = vmul.f32 %v3414_v13, %v3408_v61  ;;  %v1279_v35 = vsel %vm789_vm1, %v1268_v34, 0  ;;  %v1506_v36 = vpop.permute.xlu0 %1505 }
 0x673   : > { %v1057_v17 = vpack.c.bf16 %v1055_v15, %v1054_v14  ;;  %v1516_v39 = vsel %vm789_vm1, %v1506_v36, 0 }
 0x674   : > { %v1058_v18 = vpack.c.bf16 %v1056_v16, %v1056_v16 }
 0x675   : > { %3176 = vmatprep.mubr.msk.bf16.mxu0 %vm850_vm2, %v1057_v17  ;;  %v1264_v38 = vpop.permute.xlu1 %1263 }
 0x676   : > { %3177 = vmatmul.mubr.msk.bf16.vlgmr.msra.gmra.mrb[12].mxu0 %vm850_vm2, %v1058_v18  ;;  %v1502_v40 = vpop.permute.xlu0 %1501 }
 0x677   : > { %3181 = vmatpush3.bf16.msra.mxu0 %v3299_v46 }
 0x678   : > { %3182 = vmatprep.subr.bf16.mxu0 %v3300_v19 }
 0x679   : > { %v1508_v41 = vpop.permute.xlu1 %1507 }
 0x67a   : > { %v1519_v43 = vsel %vm789_vm1, %v1508_v41, 0 }
 0x67b   : > { %3183 = vmatpush3.bf16.msra.mxu0 %v3300_v19 }
 0x67c   : > { %3248 = vmatprep.subr.msk.bf16.mxu0 %vm789_vm1, %v1266_v20 }
 0x67d   : > { %v1504_v44 = vpop.permute.xlu1 %1503 }
 0x749   : > { %v3178_v21 = vpop.f32.mrb[12].mxu0 }
 0x74a   : > { %v1109_v22 = vpop.f32.mrb[13].mxu0  ;;  %v1124_v26 = vpack.c.bf16 %v3178_v21, %v3178_v21 }
 0x74b   : > { %v3179_v23 = vpop.f32.mrb[14].mxu0 }
 0x74c   : > { %v1112_v24 = vpop.f32.mrb[15].mxu0 }
 0x74d   : > { %v1123_v25 = vpack.c.bf16 %v1112_v24, %v1109_v22  ;;  %v3301_v24 = vld [vmem:[%s4370_s5 + $0x20] sm:$0xff]  }
 0x74f   : > { %3184 = vmatprep.mubr.msk.bf16.mxu0 %vm789_vm1, %v1123_v25 }
 0x750   : > { %3185 = vmatmul.mubr.msk.bf16.vlgmr.msra.gmra.mrb[16].mxu0 %vm789_vm1, %v1124_v26 }
 0x751   : > { %3197 = vmatpush3.bf16.xpose.msra.mxu0 %v1276_v28  ;;  %3200 = vmatprep.mubr.msk.bf16.mxu0 %vm789_vm1, %v1262_v27 }
 0x752   : > { %3249 = vmatprep.subr.msk.bf16.mxu0 %vm789_vm1, %v1268_v34 }
 0x759   : > { %3199 = vmatpush3.bf16.xpose.msra.mxu0 %v1279_v35 }
 0x75a   : > { %3250 = vmatprep.subr.msk.bf16.mxu0 %vm789_vm1, %v1506_v36 }
 0x760   : > { %3201 = vmatmul.mubr.msk.bf16.vlgmr.msra.gmra.mrb[20].mxu0 %vm789_vm1, %v1264_v38 }
 0x761   : > { %3221 = vmatpush3.bf16.xpose.msra.mxu0 %v1516_v39  ;;  %3224 = vmatprep.mubr.msk.bf16.mxu0 %vm789_vm1, %v1502_v40 }
 0x762   : > { %3251 = vmatprep.subr.msk.bf16.mxu0 %vm789_vm1, %v1508_v41 }
 0x769   : > { %3223 = vmatpush3.bf16.xpose.msra.mxu0 %v1519_v43 }
 0x770   : > { %3225 = vmatmul.mubr.msk.bf16.vlgmr.msra.gmra.mrb[24].mxu0 %vm789_vm1, %v1504_v44 }
 0x771   : > { %2057 = vmatprep.mubr.bf16.mxu0 %v3504_v37 }
 0x823   : > { %v3186_v45 = vpop.f32.mrb[16].mxu0 }
 0x824   : > { %v3829_v47 = vadd.f32 %v3798_v0, %v3186_v45  ;;  %v1181_v48 = vpop.f32.mrb[17].mxu0 }
 0x825   : > { %v3832_v49 = vadd.f32 %v3800_v1, %v1181_v48  ;;  %v3187_v50 = vpop.f32.mrb[18].mxu0 }
 0x826   : > { %v1184_v51 = vpop.f32.mrb[19].mxu0 }
 0x827   : > { %v3835_v52 = vadd.f32 %v3802_v3, %v1184_v51 }
 0x833   : > { %v3202_v53 = vpop.f32.mrb[20].mxu0 }
 0x834   : > { %v1315_v54 = vpop.f32.mrb[21].mxu0  ;;  %v1335_v59 = vsel %vm857_vm3, %v3202_v53, -inf }
 0x835   : > { %v3203_v55 = vpop.f32.mrb[22].mxu0  ;;  %v1329_v56 = vsel %vm850_vm2, %v1315_v54, -inf }
 0x836   : > { %1330 = vmax.xlane.f32.xlu0 %v1329_v56  ;;  %v1318_v57 = vpop.f32.mrb[23].mxu0 }
 0x837   : > { %v1332_v58 = vsel %vm850_vm2, %v1318_v57, -inf }
 0x838   : > { %1333 = vmax.xlane.f32.xlu1 %v1332_v58 }
 0x83a   : > { %1336 = vmax.xlane.f32.xlu0 %v1335_v59  ;;  %v3302_v59 = vld [vmem:[%s4370_s5 + $0x28] sm:$0xff]  }
 0x843   : > { %v3840_v60 = vpop.f32.mrb[24].mxu0 }
 0x844   : > { %v3842_v61 = vpop.f32.mrb[25].mxu0  ;;  %v1575_v17 = vsel %vm857_vm3, %v3840_v60, -inf }
 0x845   : > { %v3227_v62 = vpop.f32.mrb[26].mxu0  ;;  %v1569_v15 = vsel %vm850_vm2, %v3842_v61, -inf }
 0x846   : > { %v1558_v63 = vpop.f32.mrb[27].mxu0 }
 0x847   : > { %v1572_v16 = vsel %vm850_vm2, %v1558_v63, -inf }
 0x8c3   : > { %v1331_v0 = vpop.xlane.xlu0 %1330 }
 0x8c4   : > { %v1338_v1 = vsub.f32 %v1315_v54, %v1331_v0 }
 0x8c5   : > { %v1334_v2 = vpop.xlane.xlu1 %1333 }
 0x8c6   : > { %v1341_v3 = vmul.f32 1.442695, %v1338_v1  ;;  %v1339_v6 = vsub.f32 %v1318_v57, %v1334_v2 }
 0x8c7   : > { %v1337_v9 = vpop.xlane.xlu0 %1336 }
 0x8c8   : > { %3415 = vpow2.f32 %v1341_v3  ;;  %v1343_v30 = vmul.f32 1.442695, %v1339_v6  ;;  %v1340_v42 = vsub.f32 %v3202_v53, %v1337_v9 }
 0x8ca   : > { %3417 = vpow2.f32 %v1343_v30  ;;  %v1345_v10 = vmul.f32 1.442695, %v1340_v42 }
 0x8cc   : > { %3419 = vpow2.f32 %v1345_v10 }
 0x8d2   : > { %v3416_v31 = vpop.eup %3415 }
 0x8d3   : > { %v1347_v46 = vsel %vm850_vm2, %v3416_v31, 0.0 }
 0x8d4   : > { %v3418_v11 = vpop.eup %3417  ;;  %1348 = vadd.xlane.f32.xlu0 %v1347_v46 }
 0x8d5   : > { %v1350_v14 = vsel %vm850_vm2, %v3418_v11, 0.0 }
 0x8d6   : > { %v3420_v12 = vpop.eup %3419 }
 0x8d7   : > { %v1353_v13 = vsel %vm857_vm3, %v3420_v12, 0.0 }
 0x8d8   : > { %1354 = vadd.xlane.f32.xlu1 %v1353_v13  ;;  %1351 = vadd.xlane.f32.xlu0 %v1350_v14  ;;  %v3303_v14 = vld [vmem:[%s4370_s5 + $0x30] sm:$0xff]  }
 0x8e9   : > { %1366 = vrot.lane.b32.xlu1 %v3710_v29, %s3506_s21 }
 0x8ee   : > { %1364 = vrot.lane.b32.xlu0 %v3716_v32, %s3506_s21 }
 0x90d   : > { %1570 = vmax.xlane.f32.xlu1 %v1569_v15  ;;  %1573 = vmax.xlane.f32.xlu0 %v1572_v16 }
 0x911   : > { %1576 = vmax.xlane.f32.xlu0 %v1575_v17 }
 0x961   : > { %v1349_v18 = vpop.xlane.xlu0 %1348 }
 0x962   : > { %3421 = vrcp.f32 %v1349_v18 }
 0x965   : > { %v1352_v19 = vpop.xlane.xlu0 %1351  ;;  %v1355_v20 = vpop.xlane.xlu1 %1354 }
 0x966   : > { %3423 = vrcp.f32 %v1352_v19 }
 0x967   : > { %3425 = vrcp.f32 %v1355_v20 }
 0x969   : > { %v1365_v21 = vpop.permute.xlu0 %1364  ;;  %v1367_v22 = vpop.permute.xlu1 %1366 }
 0x96a   : > { %v1376_v23 = vand.u32 %v1367_v22, %v3720_v33  ;;  %3204 = vmatprep.subr.bf16.mxu1 %v1365_v21 }
 0x96b   : > { %3205 = vmatpush3.bf16.msra.mxu1 %v1365_v21 }
 0x96c   : > { %3206 = vmatprep.subr.bf16.mxu1 %v1376_v23  ;;  %v3422_v25 = vpop.eup %3421 }
 0x96d   : > { %v1359_v28 = vmul.f32 %v3422_v25, %v3416_v31 }
 0x96f   : > { %3207 = vmatpush3.bf16.msra.mxu1 %v1376_v23 }
 0x970   : > { %v3424_v26 = vpop.eup %3423  ;;  %3212 = vmatprep.subr.bf16.mxu1 %v3301_v24 }
 0x971   : > { %v3426_v27 = vpop.eup %3425  ;;  %v1360_v34 = vmul.f32 %v3424_v26, %v3418_v11 }
 0x972   : > { %v1361_v35 = vmul.f32 %v3426_v27, %v3420_v12 }
 0x973   : > { %v1362_v36 = vpack.c.bf16 %v1360_v34, %v1359_v28 }
 0x974   : > { %v1363_v38 = vpack.c.bf16 %v1361_v35, %v1361_v35  ;;  %v2944_v35 = vld [vmem:[%s4371_s6] ss:$0 sm:$0xff] }
 0x975   : > { %3208 = vmatprep.mubr.msk.bf16.mxu1 %vm850_vm2, %v1362_v36 }
 0x976   : > { %3209 = vmatmul.mubr.msk.bf16.vlgmr.msra.gmra.mrb[16].mxu1 %vm850_vm2, %v1363_v38  ;;  %v3493_v38 = vld [vmem:[%s3594_s30] sm:$0xff] }
 0x977   : > { %3213 = vmatpush3.bf16.msra.mxu1 %v3301_v24 }
 0x978   : > { %3214 = vmatprep.subr.bf16.mxu1 %v3302_v59 }
 0x97b   : > { %3215 = vmatpush3.bf16.msra.mxu1 %v3302_v59  ;;  %v3316_v59 = vld [vmem:[%s4374_s9 + $0x2c] ss:$16 sps:$4 sm:$0xff]  }
 0x99a   : > { %v1574_v39 = vpop.xlane.xlu0 %1573  ;;  %v1571_v40 = vpop.xlane.xlu1 %1570 }
 0x99b   : > { %v1579_v41 = vsub.f32 %v1558_v63, %v1574_v39  ;;  %v1578_v44 = vsub.f32 %v3842_v61, %v1571_v40 }
 0x99d   : > { %v1583_v43 = vmul.f32 1.442695, %v1579_v41  ;;  %v1581_v50 = vmul.f32 1.442695, %v1578_v44  ;;  %v3494_v41 = vld [vmem:[%s3594_s30 + $0x10] sm:$0x1] }
 0x99e   : > { %v1577_v45 = vpop.xlane.xlu0 %1576  ;;  %v3495_v44 = vld [vmem:[%s3594_s30 + $0x8] sm:$0xff] }
 0x99f   : > { %3427 = vpow2.f32 %v1583_v43  ;;  %v1580_v48 = vsub.f32 %v3840_v60, %v1577_v45 }
 0x9a1   : > { %v1585_v51 = vmul.f32 1.442695, %v1580_v48 }
 0x9a3   : > { %3429 = vpow2.f32 %v1585_v51 }
 0x9a4   : > { %3431 = vpow2.f32 %v1581_v50 }
 0x9a9   : > { %v3428_v53 = vpop.eup %3427 }
 0x9aa   : > { %v1590_v54 = vsel %vm850_vm2, %v3428_v53, 0.0 }
 0x9ab   : > { %1591 = vadd.xlane.f32.xlu0 %v1590_v54  ;;  %v3305_v54 = vld [vmem:[%s4374_s9] ss:$16 sps:$4 sm:$0xff]  }
 0x9ad   : > { %v3430_v55 = vpop.eup %3429 }
 0x9ae   : > { %v1593_v56 = vsel %vm857_vm3, %v3430_v55, 0.0  ;;  %v3432_v57 = vpop.eup %3431 }
 0x9af   : > { %1594 = vadd.xlane.f32.xlu1 %v1593_v56  ;;  %v1587_v58 = vsel %vm850_vm2, %v3432_v57, 0.0  ;;  %v3308_v56 = vld [vmem:[%s4374_s9 + $0x8] ss:$16 sps:$4 sm:$0xff]  }
 0x9b3   : > { %1588 = vadd.xlane.f32.xlu1 %v1587_v58  ;;  %v3313_v58 = vld [vmem:[%s4374_s9 + $0x24] ss:$16 sps:$4 sm:$0xff]  }
 0x9c1   : > { %1604 = vrot.lane.b32.xlu0 %v3716_v32, %s3507_s22 }
 0x9c4   : > { %1606 = vrot.lane.b32.xlu1 %v3710_v29, %s3507_s22  ;;  %s440_s22 = scalar_lea.vmem %s4378_s13, %s3252_s27 }
 0xa38   : > { %v1592_v60 = vpop.xlane.xlu0 %1591 }
 0xa39   : > { %3433 = vrcp.f32 %v1592_v60  ;;  %v3311_v60 = vld [vmem:[%s4374_s9 + $0x20] ss:$16 sps:$4 sm:$0xff]  }
 0xa3c   : > { %v1605_v61 = vpop.permute.xlu0 %1604  ;;  %v1595_v62 = vpop.xlane.xlu1 %1594 }
 0xa3d   : > { %3228 = vmatprep.subr.bf16.mxu1 %v1605_v61 }
 0xa40   : > { %v1589_v63 = vpop.xlane.xlu1 %1588 }
 0xa41   : > { %3435 = vrcp.f32 %v1589_v63 }
 0xa42   : > { %3437 = vrcp.f32 %v1595_v62 }
 0xa43   : > { %v3434_v0 = vpop.eup %3433 }
 0xa44   : > { %v1600_v42 = vmul.f32 %v3434_v0, %v3428_v53  ;;  %v1607_v32 = vpop.permute.xlu1 %1606 }
 0xa45   : > { %v1616_v11 = vand.u32 %v1607_v32, %v3720_v33  ;;  %v3304_v33 = vld [vmem:[%s4370_s5 + $0x38] sm:$0xff]  }
 0xa49   : > { %v3210_v1 = vpop.f32.mrb[16].mxu1 }
 0xa4a   : > { %v1412_v2 = vpop.f32.mrb[17].mxu1  ;;  %v1427_v31 = vpack.c.bf16 %v3210_v1, %v3210_v1 }
 0xa4b   : > { %v3436_v3 = vpop.eup %3435  ;;  %v3211_v6 = vpop.f32.mrb[18].mxu1 }
 0xa4c   : > { %v1415_v9 = vpop.f32.mrb[19].mxu1  ;;  %v1599_v30 = vmul.f32 %v3436_v3, %v3432_v57  ;;  %v3438_v46 = vpop.eup %3437  ;;  %v3310_v57 = vld [vmem:[%s4374_s9 + $0xc] ss:$16 sps:$4 sm:$0xff]  }
 0xa4d   : > { %v1426_v10 = vpack.c.bf16 %v1415_v9, %v1412_v2  ;;  %v1601_v12 = vmul.f32 %v3438_v46, %v3430_v55  ;;  %v3307_v55 = vld [vmem:[%s4374_s9 + $0x4] ss:$16 sps:$4 sm:$0xff]   ;;  %v3322_v46 = vld [vmem:[%s4374_s9 + $0x4c] ss:$16 sps:$4 sm:$0xff]  }
 0xa4e   : > { %v1602_v29 = vpack.c.bf16 %v1600_v42, %v1599_v30  ;;  %2025 = vmatprep.subr.bf16.mxu0 %v3307_v55 }
 0xa4f   : > { %3216 = vmatprep.mubr.msk.bf16.mxu1 %vm789_vm1, %v1426_v10  ;;  %v1603_v13 = vpack.c.bf16 %v1601_v12, %v1601_v12  ;;  %2026 = vmatpush1.bf16.msra.mxu0 %v3305_v54  ;;  %v3320_v12 = vld [vmem:[%s4374_s9 + $0x48] ss:$16 sps:$4 sm:$0xff]  }
 0xa50   : > { %3217 = vmatmul.mubr.msk.bf16.vlgmr.msra.gmra.mrb[20].mxu1 %vm789_vm1, %v1427_v31  ;;  %2027 = vmatprep.subr.bf16.mxu0 %v3313_v58  ;;  %v2946_v58 = vld [vmem:[%s4373_s8] ss:$0 sm:$0xff] }
 0xa51   : > { %3229 = vmatpush3.bf16.msra.mxu1 %v1605_v61  ;;  %3232 = vmatprep.mubr.msk.bf16.mxu1 %vm850_vm2, %v1602_v29  ;;  %v3314_v61 = vld [vmem:[%s4374_s9 + $0x28] ss:$16 sps:$4 sm:$0xff]   ;;  %v3319_v29 = vld [vmem:[%s4374_s9 + $0x44] ss:$16 sps:$4 sm:$0xff]  }
 0xa52   : > { %3230 = vmatprep.subr.bf16.mxu1 %v1616_v11 }
 0xa53   : > { %2028 = vmatpush1.bf16.msra.mxu0 %v3311_v60 }
 0xa54   : > { %2029 = vmatprep.subr.bf16.mxu0 %v3319_v29  ;;  %v3361_v29 = vld [vmem:[%s4376_s11 + $0x50] sm:$0xff]  }
 0xa55   : > { %3231 = vmatpush3.bf16.msra.mxu1 %v1616_v11  ;;  %v3317_v11 = vld [vmem:[%s4374_s9 + $0x40] ss:$16 sps:$4 sm:$0xff]  }
 0xa56   : > { %3236 = vmatprep.subr.bf16.mxu1 %v3303_v14 }
 0xa57   : > { %2030 = vmatpush1.bf16.msra.mxu0 %v3317_v11  ;;  %v3363_v11 = vld [vmem:[%s4376_s11 + $0x10] sm:$0xff]  }
 0xa58   : > { %3233 = vmatmul.mubr.msk.bf16.vlgmr.msra.gmra.mrb[24].mxu1 %vm850_vm2, %v1603_v13  ;;  %v3325_v13 = vld [vmem:[%s4374_s9 + $0x64] ss:$16 sps:$4 sm:$0xff]  }
 0xa59   : > { %3237 = vmatpush3.bf16.msra.mxu1 %v3303_v14  ;;  %v3328_v14 = vld [vmem:[%s4374_s9 + $0x6c] ss:$16 sps:$4 sm:$0xff]   ;;  %2031 = vmatprep.subr.bf16.mxu0 %v3325_v13 }
 0xa5a   : > { %3238 = vmatprep.subr.bf16.mxu1 %v3304_v33  ;;  %v3365_v13 = vld [vmem:[%s4376_s11 + $0x58] sm:$0xff]  }
 0xa5d   : > { %3239 = vmatpush3.bf16.msra.mxu1 %v3304_v33  ;;  %v3323_v33 = vld [vmem:[%s4374_s9 + $0x60] ss:$16 sps:$4 sm:$0xff]  }
 0xa5e   : > { %2076 = vmatprep.subr.bf16.mxu1 %v3310_v57  ;;  %2032 = vmatpush1.bf16.msra.mxu0 %v3323_v33  ;;  %v3367_v33 = vld [vmem:[%s4376_s11 + $0x18] sm:$0xff]  }
 0xb23   : > { %v3218_v15 = vpop.f32.mrb[20].mxu1 }
 0xb24   : > { %v1500_v16 = vadd.f32 %v3218_v15, %v3829_v47  ;;  %v1484_v17 = vpop.f32.mrb[21].mxu1  ;;  %v3326_v15 = vld [vmem:[%s4374_s9 + $0x68] ss:$16 sps:$4 sm:$0xff]  }
 0xb25   : > { %v1498_v18 = vadd.f32 %v1484_v17, %v3832_v49  ;;  %v3219_v19 = vpop.f32.mrb[22].mxu1  ;;  %v3334_v17 = vld [vmem:[%s4374_s9 + $0x8c] ss:$16 sps:$4 sm:$0xff]  }
 0xb26   : > { %v1487_v20 = vpop.f32.mrb[23].mxu1  ;;  %v3332_v19 = vld [vmem:[%s4374_s9 + $0x88] ss:$16 sps:$4 sm:$0xff]  }
 0xb27   : > { %v1499_v21 = vadd.f32 %v1487_v20, %v3835_v52  ;;  %v3337_v20 = vld [vmem:[%s4374_s9 + $0xa4] ss:$16 sps:$4 sm:$0xff]  }
 0xb2b   : > { %v3234_v22 = vpop.f32.mrb[24].mxu1 }
 0xb2c   : > { %v1652_v23 = vpop.f32.mrb[25].mxu1  ;;  %v1667_v27 = vpack.c.bf16 %v3234_v22, %v3234_v22  ;;  %v3335_v22 = vld [vmem:[%s4374_s9 + $0xa0] ss:$16 sps:$4 sm:$0xff]  }
 0xb2d   : > { %v3235_v24 = vpop.f32.mrb[26].mxu1 }
 0xb2e   : > { %v1655_v25 = vpop.f32.mrb[27].mxu1  ;;  %v3343_v24 = vld [vmem:[%s4374_s9 + $0xc4] ss:$16 sps:$4 sm:$0xff]  }
 0xb2f   : > { %v1666_v26 = vpack.c.bf16 %v1655_v25, %v1652_v23  ;;  %v3338_v23 = vld [vmem:[%s4374_s9 + $0xa8] ss:$16 sps:$4 sm:$0xff]   ;;  %v3346_v25 = vld [vmem:[%s4374_s9 + $0xcc] ss:$16 sps:$4 sm:$0xff]  }
 0xb31   : > { %3240 = vmatprep.mubr.msk.bf16.mxu1 %vm789_vm1, %v1666_v26  ;;  %v3341_v26 = vld [vmem:[%s4374_s9 + $0xc0] ss:$16 sps:$4 sm:$0xff]  }
 0xb32   : > { %3241 = vmatmul.mubr.msk.bf16.vlgmr.msra.gmra.mrb[28].mxu1 %vm789_vm1, %v1667_v27  ;;  %v3344_v27 = vld [vmem:[%s4374_s9 + $0xc8] ss:$16 sps:$4 sm:$0xff]  }
 0xb33   : > { %2108 = vmatprep.mubr.bf16.mxu1 %v3504_v37  ;;  %2077 = vmatpush1.bf16.msra.mxu1 %v3308_v56 }
 0xb34   : > { %2078 = vmatprep.subr.bf16.mxu1 %v3316_v59 }
 0xb37   : > { %2079 = vmatpush1.bf16.msra.mxu1 %v3314_v61 }
 0xb38   : > { %2080 = vmatprep.subr.bf16.mxu1 %v3322_v46  ;;  %v3362_v46 = vld [vmem:[%s4376_s11 + $0xd0] sm:$0xff]  }
 0xb3b   : > { %2081 = vmatpush1.bf16.msra.mxu1 %v3320_v12  ;;  %v3364_v12 = vld [vmem:[%s4376_s11 + $0x90] sm:$0xff]  }
 0xb3c   : > { %2082 = vmatprep.subr.bf16.mxu1 %v3328_v14  ;;  %v3366_v14 = vld [vmem:[%s4376_s11 + $0xd8] sm:$0xff]  }
 0xb3f   : > { %2083 = vmatpush1.bf16.msra.mxu1 %v3326_v15  ;;  %v3368_v15 = vld [vmem:[%s4376_s11 + $0x98] sm:$0xff]  }
 0xb40   : > { %2084 = vmatprep.subr.bf16.mxu1 %v3334_v17  ;;  %v3370_v17 = vld [vmem:[%s4376_s11 + $0xe0] sm:$0xff]  }
 0xb43   : > { %2085 = vmatpush1.bf16.msra.mxu1 %v3332_v19  ;;  %v3372_v19 = vld [vmem:[%s4376_s11 + $0xa0] sm:$0xff]  }
 0xc05   : > { %v3242_v47 = vpop.f32.mrb[28].mxu1 }
 0xc06   : > { %v1740_v49 = vadd.f32 %v3242_v47, %v1500_v16  ;;  %v1724_v28 = vpop.f32.mrb[29].mxu1  ;;  %v3331_v16 = vld [vmem:[%s4374_s9 + $0x84] ss:$16 sps:$4 sm:$0xff]  }
 0xc07   : > { %v1738_v34 = vadd.f32 %v1724_v28, %v1498_v18  ;;  %v3243_v52 = vpop.f32.mrb[30].mxu1  ;;  %v3329_v18 = vld [vmem:[%s4374_s9 + $0x80] ss:$16 sps:$4 sm:$0xff]   ;;  %2033 = vmatprep.subr.bf16.mxu0 %v3331_v16  ;;  %v3349_v47 = vld [vmem:[%s4374_s9 + $0xe4] ss:$16 sps:$4 sm:$0xff]  }
 0xc08   : > { %v1727_v36 = vpop.f32.mrb[31].mxu1  ;;  %v1743_v43 = vadd.f32 %v3494_v41, %v1740_v49  ;;  %2034 = vmatpush1.bf16.msra.mxu0 %v3329_v18  ;;  %v3352_v49 = vld [vmem:[%s4374_s9 + $0xec] ss:$16 sps:$4 sm:$0xff]   ;;  %v3347_v28 = vld [vmem:[%s4374_s9 + $0xe0] ss:$16 sps:$4 sm:$0xff]  }
 0xc09   : > { %v1741_v39 = vadd.f32 %v3493_v38, %v1738_v34  ;;  %v1739_v40 = vadd.f32 %v1727_v36, %v1499_v21  ;;  %v3340_v21 = vld [vmem:[%s4374_s9 + $0xac] ss:$16 sps:$4 sm:$0xff]   ;;  %2035 = vmatprep.subr.bf16.mxu0 %v3337_v20  ;;  %v3350_v34 = vld [vmem:[%s4374_s9 + $0xe8] ss:$16 sps:$4 sm:$0xff]   ;;  %v3369_v16 = vld [vmem:[%s4376_s11 + $0x60] sm:$0xff]  }
 0xc0a   : > { %v3902_v51 = vadd.f32 %v2944_v35, %v1743_v43  ;;  %2086 = vmatprep.subr.bf16.mxu1 %v3340_v21  ;;  %v3371_v18 = vld [vmem:[%s4376_s11 + $0x20] sm:$0xff]   ;;  %v3373_v20 = vld [vmem:[%s4376_s11 + $0x68] sm:$0xff]  }
 0xc0b   : > { %v1742_v45 = vadd.f32 %v3495_v44, %v1739_v40  ;;  %v3897_v48 = vadd.f32 %v2944_v35, %v1741_v39  ;;  %2087 = vmatpush1.bf16.msra.mxu1 %v3338_v23  ;;  %v3374_v21 = vld [vmem:[%s4376_s11 + $0xe8] sm:$0xff]  }
 0xc0c   : > { %v1760_v53 = vsel %vm451_vm0, %v3902_v51, 0.0  ;;  %2036 = vmatpush1.bf16.msra.mxu0 %v3335_v22  ;;  %2088 = vmatprep.subr.bf16.mxu1 %v3346_v25  ;;  %v3375_v22 = vld [vmem:[%s4376_s11 + $0x28] sm:$0xff]   ;;  %v3378_v25 = vld [vmem:[%s4376_s11 + $0xf0] sm:$0xff]  }
 0xc0d   : > { %1756 = vadd.xlane.f32.xlu1 %v3897_v48  ;;  %v3900_v50 = vadd.f32 %v2944_v35, %v1742_v45  ;;  %2037 = vmatprep.subr.bf16.mxu0 %v3343_v24  ;;  %v3376_v23 = vld [vmem:[%s4376_s11 + $0xa8] sm:$0xff]   ;;  %v3377_v24 = vld [vmem:[%s4376_s11 + $0x70] sm:$0xff]  }
 0xc0f   : > { %1758 = vadd.xlane.f32.xlu0 %v3900_v50  ;;  %2089 = vmatpush1.bf16.msra.mxu1 %v3344_v27  ;;  %v3380_v27 = vld [vmem:[%s4376_s11 + $0xb0] sm:$0xff]  }
 0xc10   : > { %2038 = vmatpush1.bf16.msra.mxu0 %v3341_v26  ;;  %2090 = vmatprep.subr.bf16.mxu1 %v3352_v49  ;;  %v3379_v26 = vld [vmem:[%s4376_s11 + $0x30] sm:$0xff]   ;;  %v3382_v49 = vld [vmem:[%s4376_s11 + $0xf8] sm:$0xff]  }
 0xc11   : > { %2039 = vmatprep.subr.bf16.mxu0 %v3349_v47  ;;  %v3381_v47 = vld [vmem:[%s4376_s11 + $0x78] sm:$0xff]  }
 0xc13   : > { %1761 = vadd.xlane.f32.xlu0 %v1760_v53  ;;  %2091 = vmatpush1.bf16.msra.mxu1 %v3350_v34  ;;  %v2945_v53 = vld [vmem:[%s4372_s7] ss:$0 sm:$0xff]  ;;  %v3384_v34 = vld [vmem:[%s4376_s11 + $0xb8] sm:$0xff]  }
 0xc14   : > { %2040 = vmatpush1.bf16.msra.mxu0 %v3347_v28  ;;  %v3383_v28 = vld [vmem:[%s4376_s11 + $0x38] sm:$0xff]  }
 0xc9a   : > { %v1757_v62 = vpop.xlane.xlu1 %1756 }
 0xc9b   : > { %v1763_v63 = vmul.f32 0.0078125, %v1757_v62 }
 0xc9c   : > { %v1759_v0 = vpop.xlane.xlu0 %1758 }
 0xc9d   : > { %v3932_v1 = vsub.f32 %v3897_v48, %v1763_v63  ;;  %v1764_v2 = vmul.f32 0.0078125, %v1759_v0 }
 0xc9f   : > { %v3935_v3 = vsub.f32 %v3900_v50, %v1764_v2  ;;  %v1769_v6 = vmul.f32 %v3932_v1, %v3932_v1 }
 0xca0   : > { %v1762_v9 = vpop.xlane.xlu0 %1761 }
 0xca1   : > { %v1765_v30 = vmul.f32 0.0078125, %v1762_v9  ;;  %1772 = vadd.xlane.f32.xlu1 %v1769_v6  ;;  %v1770_v42 = vmul.f32 %v3935_v3, %v3935_v3  ;;  %v3353_v6 = vld [vmem:[%s4376_s11 + $0x40] sm:$0xff]  }
 0xca2   : > { %v3354_v9 = vld [vmem:[%s4376_s11 + $0xc0] sm:$0xff]   ;;  %3072 = vmatprep.subr.bf16.mxu0 %v3353_v6 }
 0xca3   : > { %v3942_v32 = vsub.f32 %v3902_v51, %v1765_v30  ;;  %1774 = vadd.xlane.f32.xlu0 %v1770_v42  ;;  %v3355_v30 = vld [vmem:[%s4376_s11] sm:$0xff]   ;;  %v3357_v42 = vld [vmem:[%s4376_s11 + $0x48] sm:$0xff]   ;;  %3100 = vmatprep.subr.bf16.mxu1 %v3354_v9 }
 0xca5   : > { %v1771_v10 = vmul.f32 %v3942_v32, %v3942_v32 }
 0xca7   : > { %v1776_v31 = vsel %vm451_vm0, %v1771_v10, 0.0  ;;  %v3359_v10 = vld [vmem:[%s4376_s11 + $0x8] sm:$0xff]  }
 0xca8   : > { %1777 = vadd.xlane.f32.xlu1 %v1776_v31  ;;  %v3360_v31 = vld [vmem:[%s4376_s11 + $0x88] sm:$0xff]  }
 0xd2e   : > { %v1773_v52 = vpop.xlane.xlu1 %1772 }
 0xd2f   : > { %v1779_v35 = vmul.f32 0.0078125, %v1773_v52  ;;  %v1843_v52 = vld [vmem:[%s4375_s10] sm:$0xf] }
 0xd30   : > { %v1775_v36 = vpop.xlane.xlu0 %1774 }
 0xd31   : > { %v1782_v38 = vadd.f32 1e-06, %v1779_v35  ;;  %v1780_v39 = vmul.f32 0.0078125, %v1775_v36  ;;  %v1859_v35 = vsub.s32 3, %v3696_v4  ;;  %v4132_v36 = vrot.slane %v1843_v52, %v540_v5 }
 0xd33   : > { %3439 = vrsqrt.f32 %v1782_v38  ;;  %v1783_v40 = vadd.f32 1e-06, %v1780_v39  ;;  %v4136_v38 = vrot.slane %v1843_v52, %v548_v7  ;;  %v4140_v39 = vrot.slane %v1843_v52, %v544_v8 }
 0xd35   : > { %3441 = vrsqrt.f32 %v1783_v40  ;;  %v1778_v41 = vpop.xlane.xlu1 %1777  ;;  %v4142_v40 = vrot.slane %v1843_v52, %v1859_v35 }
 0xd36   : > { %v1781_v43 = vmul.f32 0.0078125, %v1778_v41 }
 0xd38   : > { %v1784_v44 = vadd.f32 1e-06, %v1781_v43 }
 0xd3a   : > { %3443 = vrsqrt.f32 %v1784_v44 }
 0xd3d   : > { %v3440_v45 = vpop.eup %3439 }
 0xd3e   : > { %v1788_v54 = vmul.f32 %v3440_v45, %v3932_v1 }
 0xd3f   : > { %v3442_v55 = vpop.eup %3441 }
 0xd40   : > { %v1789_v56 = vmul.f32 %v3442_v55, %v3935_v3  ;;  %v1797_v57 = vmul.f32 %v2945_v53, %v1788_v54 }
 0xd42   : > { %v1798_v59 = vmul.f32 %v2945_v53, %v1789_v56  ;;  %v1806_v61 = vadd.f32 %v2946_v58, %v1797_v57 }
 0xd44   : > { %v3444_v60 = vpop.eup %3443  ;;  %v1807_v62 = vadd.f32 %v2946_v58, %v1798_v59 }
 0xd45   : > { %v1790_v63 = vmul.f32 %v3444_v60, %v3942_v32  ;;  %v3358_v32 = vld [vmem:[%s4376_s11 + $0xc8] sm:$0xff]  }
 0xd46   : > { %v1809_v0 = vpack.c.bf16 %v1807_v62, %v1806_v61 }
 0xd47   : > { %v1799_v2 = vmul.f32 %v2945_v53, %v1790_v63 }
 0xd48   : > { %2058 = vmatmul.mubr.bf16.vlgmr.msra.gmra.mrb[28].mxu0 %v1809_v0  ;;  %2109 = vmatmul.mubr.bf16.vlgmr.msra.gmra.mrb[32].mxu1 %v1809_v0 }
 0xd49   : > { %2067 = vmatprep.mubr.bf16.mxu0 %v3504_v37  ;;  %2118 = vmatprep.mubr.bf16.mxu1 %v3504_v37  ;;  %v1808_v1 = vadd.f32 %v2946_v58, %v1799_v2  ;;  %v3356_v37 = vld [vmem:[%s4376_s11 + $0x80] sm:$0xff]  }
 0xd4a   : > { %3073 = vmatpush3.bf16.msra.mxu0 %v3355_v30  ;;  %3101 = vmatpush3.bf16.msra.mxu1 %v3356_v37 }
 0xd4b   : > { %v1810_v3 = vpack.c.bf16 %v1808_v1, %v1808_v1  ;;  %3074 = vmatprep.subr.bf16.mxu0 %v3357_v42  ;;  %3102 = vmatprep.subr.bf16.mxu1 %v3358_v32 }
 0xd4e   : > { %3075 = vmatpush3.bf16.msra.mxu0 %v3359_v10  ;;  %3103 = vmatpush3.bf16.msra.mxu1 %v3360_v31 }
 0xd4f   : > { %3076 = vmatprep.subr.bf16.mxu0 %v3361_v29  ;;  %3104 = vmatprep.subr.bf16.mxu1 %v3362_v46 }
 0xd50   : > { %2068 = vmatmul.mubr.bf16.gmra.mrb[32].mxu0 %v1810_v3  ;;  %2119 = vmatmul.mubr.bf16.gmra.mrb[36].mxu1 %v1810_v3 }
 0xd52   : > { %3077 = vmatpush3.bf16.msra.mxu0 %v3363_v11  ;;  %3105 = vmatpush3.bf16.msra.mxu1 %v3364_v12 }
 0xd53   : > { %3078 = vmatprep.subr.bf16.mxu0 %v3365_v13  ;;  %3106 = vmatprep.subr.bf16.mxu1 %v3366_v14 }
 0xd56   : > { %3079 = vmatpush3.bf16.msra.mxu0 %v3367_v33  ;;  %3107 = vmatpush3.bf16.msra.mxu1 %v3368_v15 }
 0xd57   : > { %3080 = vmatprep.subr.bf16.mxu0 %v3369_v16  ;;  %3108 = vmatprep.subr.bf16.mxu1 %v3370_v17 }
 0xd5a   : > { %3081 = vmatpush3.bf16.msra.mxu0 %v3371_v18  ;;  %3109 = vmatpush3.bf16.msra.mxu1 %v3372_v19 }
 0xd5b   : > { %3082 = vmatprep.subr.bf16.mxu0 %v3373_v20  ;;  %3110 = vmatprep.subr.bf16.mxu1 %v3374_v21 }
 0xd5e   : > { %3083 = vmatpush3.bf16.msra.mxu0 %v3375_v22  ;;  %3111 = vmatpush3.bf16.msra.mxu1 %v3376_v23 }
 0xd5f   : > { %3084 = vmatprep.subr.bf16.mxu0 %v3377_v24  ;;  %3112 = vmatprep.subr.bf16.mxu1 %v3378_v25 }
 0xd62   : > { %3085 = vmatpush3.bf16.msra.mxu0 %v3379_v26  ;;  %3113 = vmatpush3.bf16.msra.mxu1 %v3380_v27 }
 0xd63   : > { %3086 = vmatprep.subr.bf16.mxu0 %v3381_v47  ;;  %3114 = vmatprep.subr.bf16.mxu1 %v3382_v49 }
 0xd66   : > { %3087 = vmatpush3.bf16.msra.mxu0 %v3383_v28  ;;  %3115 = vmatpush3.bf16.msra.mxu1 %v3384_v34 }
 0xe1b   : > { %v2059_v41 = vpop.f32.mrb[28].mxu0  ;;  %v2110_v43 = vpop.f32.mrb[32].mxu1 }
 0xe1c   : > { %v2060_v44 = vadd.f32 %v2059_v41, %v4132_v36  ;;  %v4146_v45 = vadd.f32 %v2110_v43, %v4136_v38  ;;  %v2061_v53 = vpop.f32.mrb[29].mxu0  ;;  %v2112_v5 = vpop.f32.mrb[33].mxu1 }
 0xe1d   : > { %v2062_v54 = vadd.f32 %v2061_v53, %v4140_v39  ;;  %v4150_v7 = vadd.f32 %v2112_v5, %v4142_v40  ;;  %v2063_v55 = vpop.f32.mrb[30].mxu0  ;;  %v2114_v4 = vpop.f32.mrb[34].mxu1 }
 0xe1e   : > { %v4152_v8 = vmul.f32 0.70710677, %v2060_v44  ;;  %v4155_v56 = vmul.f32 0.70710677, %v4146_v45  ;;  %v2065_v9 = vpop.f32.mrb[31].mxu0  ;;  %v2116_v30 = vpop.f32.mrb[35].mxu1  ;;  %v2064_v10 = vadd.f32 %v2063_v55, %v4132_v36  ;;  %v4176_v46 = vadd.f32 %v2114_v4, %v4136_v38 }
 0xe1f   : > { %v4157_v57 = vmul.f32 0.70710677, %v2062_v54  ;;  %v4160_v58 = vmul.f32 0.70710677, %v4150_v7  ;;  %v4181_v33 = vadd.f32 %v2065_v9, %v4140_v39  ;;  %v4188_v22 = vadd.f32 %v2116_v30, %v4142_v40 }
 0xe20   : > { %v2151_v59 = vand.u32 2147483647, %v4152_v8  ;;  %v2153_v60 = vand.u32 2147483647, %v4155_v56  ;;  %v4178_v14 = vmul.f32 0.70710677, %v2064_v10 }
 0xe21   : > { %v2152_v61 = vand.u32 2147483647, %v4157_v57  ;;  %v2154_v62 = vand.u32 2147483647, %v4160_v58  ;;  %v4184_v19 = vmul.f32 0.70710677, %v4176_v46 }
 0xe22   : > { %v2163_v63 = vmul.f32 0.3275911, %v2151_v59  ;;  %v2165_v0 = vmul.f32 0.3275911, %v2153_v60  ;;  %v2319_v17 = vsub.f32 0.0, %v2151_v59  ;;  %v2321_v18 = vsub.f32 0.0, %v2153_v60 }
 0xe23   : > { %v2164_v2 = vmul.f32 0.3275911, %v2152_v61  ;;  %v2166_v6 = vmul.f32 0.3275911, %v2154_v62  ;;  %v4166_v37 = vpop.f32.mrb[32].mxu0  ;;  %v4168_v42 = vpop.f32.mrb[36].mxu1 }
 0xe24   : > { %v2175_v1 = vadd.f32 1.0, %v2163_v63  ;;  %v2177_v3 = vadd.f32 1.0, %v2165_v0  ;;  %v4171_v31 = vpop.f32.mrb[33].mxu0  ;;  %v4173_v29 = vpop.f32.mrb[37].mxu1  ;;  %v2320_v20 = vsub.f32 0.0, %v2152_v61  ;;  %v2322_v23 = vsub.f32 0.0, %v2154_v62 }
 0xe25   : > { %v2176_v32 = vadd.f32 1.0, %v2164_v2  ;;  %v2073_v11 = vpop.f32.mrb[34].mxu0  ;;  %v2124_v12 = vpop.f32.mrb[38].mxu1  ;;  %v2178_v13 = vadd.f32 1.0, %v2166_v6  ;;  %v2155_v21 = vand.u32 2147483647, %v4178_v14  ;;  %v2331_v47 = vmul.f32 %v2319_v17, %v2151_v59 }
 0xe26   : > { %3445 = vrcp.f32 %v2175_v1  ;;  %v2074_v15 = vpop.f32.mrb[35].mxu0  ;;  %v2125_v16 = vpop.f32.mrb[39].mxu1  ;;  %v2157_v24 = vand.u32 2147483647, %v4184_v19  ;;  %v4192_v25 = vmul.f32 0.70710677, %v4181_v33  ;;  %v2333_v49 = vmul.f32 %v2321_v18, %v2153_v60 }
 0xe27   : > { %3447 = vrcp.f32 %v2177_v3  ;;  %v4194_v26 = vmul.f32 0.5, %v2060_v44  ;;  %v2167_v27 = vmul.f32 0.3275911, %v2155_v21  ;;  %v2332_v52 = vmul.f32 %v2320_v20, %v2152_v61 }
 0xe28   : > { %3449 = vrcp.f32 %v2176_v32  ;;  %v2169_v28 = vmul.f32 0.3275911, %v2157_v24  ;;  %v2156_v34 = vand.u32 2147483647, %v4192_v25  ;;  %v2323_v41 = vsub.f32 0.0, %v2155_v21 }
 0xe29   : > { %3451 = vrcp.f32 %v2178_v13  ;;  %v2179_v35 = vadd.f32 1.0, %v2167_v27  ;;  %v4198_v43 = vmul.f32 0.70710677, %v4188_v22  ;;  %v2334_v53 = vmul.f32 %v2322_v23, %v2154_v62 }
 0xe2a   : > { %v2181_v5 = vadd.f32 1.0, %v2169_v28  ;;  %v2325_v55 = vsub.f32 0.0, %v2157_v24  ;;  %v2168_v4 = vmul.f32 0.3275911, %v2156_v34  ;;  %v4203_v44 = vmul.f32 0.5, %v4146_v45 }
 0xe2b   : > { %v4205_v59 = vmul.f32 0.5, %v2062_v54  ;;  %3453 = vrcp.f32 %v2179_v35  ;;  %v2158_v60 = vand.u32 2147483647, %v4198_v43  ;;  %v2343_v2 = vmul.f32 1.442695, %v2331_v47 }
 0xe2c   : > { %3455 = vrcp.f32 %v2181_v5  ;;  %v2180_v62 = vadd.f32 1.0, %v2168_v4  ;;  %v2347_v3 = vmul.f32 1.442695, %v2333_v49  ;;  %v2335_v6 = vmul.f32 %v2323_v41, %v2155_v21 }
 0xe2d   : > { %v2170_v9 = vmul.f32 0.3275911, %v2158_v60  ;;  %v2345_v45 = vmul.f32 1.442695, %v2332_v52  ;;  %v2349_v32 = vmul.f32 1.442695, %v2334_v53  ;;  %v2337_v54 = vmul.f32 %v2325_v55, %v2157_v24 }
 0xe2e   : > { %3457 = vrcp.f32 %v2180_v62  ;;  %v4216_v15 = vadd.f32 %v4166_v37, %v4132_v36  ;;  %v4220_v18 = vmul.f32 0.5, %v2064_v10  ;;  %v2351_v23 = vmul.f32 1.442695, %v2335_v6 }
 0xe2f   : > { %v2182_v13 = vadd.f32 1.0, %v2170_v9  ;;  %3459 = vpow2.f32 %v2343_v2  ;;  %v2324_v24 = vsub.f32 0.0, %v2156_v34  ;;  %v2355_v37 = vmul.f32 1.442695, %v2337_v54 }
 0xe30   : > { %v4200_v63 = vpop.eup %3445  ;;  %3461 = vpow2.f32 %v2347_v3  ;;  %v4227_v28 = vmul.f32 0.70710677, %v4216_v15  ;;  %v2326_v55 = vsub.f32 0.0, %v2158_v60  ;;  %vm2391_vm4 = vcmp.ge.f32.partialorder %v4152_v8, 0.0 }
 0xe31   : > { %v4208_v61 = vpop.eup %3447  ;;  %v2211_v0 = vmul.f32 1.0614054, %v4200_v63  ;;  %3463 = vrcp.f32 %v2182_v13  ;;  %v2336_v5 = vmul.f32 %v2324_v24, %v2156_v34  ;;  %vm2393_vm5 = vcmp.ge.f32.partialorder %v4155_v56, 0.0 }
 0xe32   : > { %v2213_v1 = vmul.f32 1.0614054, %v4208_v61  ;;  %v4212_v11 = vpop.eup %3449  ;;  %3465 = vpow2.f32 %v2345_v45  ;;  %v4240_v9 = vand.u32 2147483647, %v4227_v28  ;;  %vm2392_vm6 = vcmp.ge.f32.partialorder %v4157_v57, 0.0 }
 0xe33   : > { %v2223_v30 = vadd.f32 -1.4531521, %v2211_v0  ;;  %v2212_v17 = vmul.f32 1.0614054, %v4212_v11  ;;  %v4222_v20 = vpop.eup %3451  ;;  %3467 = vpow2.f32 %v2349_v32  ;;  %vm2395_vm7 = vcmp.ge.f32.partialorder %v4178_v14, 0.0 }
 0xe34   : > { %v2225_v12 = vadd.f32 -1.4531521, %v2213_v1  ;;  %v2214_v49 = vmul.f32 1.0614054, %v4222_v20  ;;  %3469 = vpow2.f32 %v2351_v23  ;;  %vm2397_vm8 = vcmp.ge.f32.partialorder %v4184_v19, 0.0 }
 0xe35   : > { %v2235_v16 = vmul.f32 %v4200_v63, %v2223_v30  ;;  %v2224_v47 = vadd.f32 -1.4531521, %v2212_v17  ;;  %v4231_v41 = vpop.eup %3453  ;;  %3471 = vpow2.f32 %v2355_v37  ;;  %v2338_v17 = vmul.f32 %v2326_v55, %v2158_v60 }
 0xe36   : > { %v2237_v21 = vmul.f32 %v4208_v61, %v2225_v12  ;;  %v2226_v35 = vadd.f32 -1.4531521, %v2214_v49  ;;  %v4234_v4 = vpop.eup %3455  ;;  %v2215_v1 = vmul.f32 1.0614054, %v4231_v41  ;;  %vm2396_vm9 = vcmp.ge.f32.partialorder %v4192_v25, 0.0 }
 0xe37   : > { %v2247_v27 = vadd.f32 1.4214138, %v2235_v16  ;;  %v2236_v52 = vmul.f32 %v4212_v11, %v2224_v47  ;;  %v2217_v6 = vmul.f32 1.0614054, %v4234_v4  ;;  %v2353_v16 = vmul.f32 1.442695, %v2336_v5 }
 0xe38   : > { %v2249_v36 = vadd.f32 1.4214138, %v2237_v21  ;;  %v2238_v62 = vmul.f32 %v4222_v20, %v2226_v35  ;;  %v2227_v32 = vadd.f32 -1.4531521, %v2215_v1  ;;  %v4244_v54 = vpop.eup %3457  ;;  %vm2394_vm10 = vcmp.ge.f32.partialorder %v4160_v58, 0.0 }
 0xe39   : > { %v2259_v10 = vmul.f32 %v4200_v63, %v2247_v27  ;;  %v2248_v2 = vadd.f32 1.4214138, %v2236_v52  ;;  %v2229_v13 = vadd.f32 -1.4531521, %v2217_v6  ;;  %v3460_v21 = vpop.eup %3459  ;;  %v2171_v52 = vmul.f32 0.3275911, %v4240_v9 }
 0xe3a   : > { %v2261_v53 = vmul.f32 %v4208_v61, %v2249_v36  ;;  %v2250_v45 = vadd.f32 1.4214138, %v2238_v62  ;;  %v2239_v47 = vmul.f32 %v4231_v41, %v2227_v32  ;;  %v3462_v49 = vpop.eup %3461  ;;  %3473 = vpow2.f32 %v2353_v16 }
 0xe3b   : > { %v2271_v0 = vadd.f32 -0.28449672, %v2259_v10  ;;  %v2260_v34 = vmul.f32 %v4212_v11, %v2248_v2  ;;  %v2241_v37 = vmul.f32 %v4234_v4, %v2229_v13  ;;  %v2216_v10 = vmul.f32 1.0614054, %v4244_v54  ;;  %v4252_v35 = vpop.eup %3463 }
 0xe3c   : > { %v2273_v3 = vadd.f32 -0.28449672, %v2261_v53  ;;  %v2262_v27 = vmul.f32 %v4222_v20, %v2250_v45  ;;  %v2251_v55 = vadd.f32 1.4214138, %v2239_v47  ;;  %vm2398_vm11 = vcmp.ge.f32.partialorder %v4198_v43, 0.0 }
 0xe3d   : > { %v2283_v30 = vmul.f32 %v4200_v63, %v2271_v0  ;;  %v2272_v24 = vadd.f32 -0.28449672, %v2260_v34  ;;  %v3466_v0 = vpop.eup %3465  ;;  %v2253_v62 = vadd.f32 1.4214138, %v2241_v37  ;;  %v2228_v1 = vadd.f32 -1.4531521, %v2216_v10 }
 0xe3e   : > { %v2285_v12 = vmul.f32 %v4208_v61, %v2273_v3  ;;  %v2274_v5 = vadd.f32 -0.28449672, %v2262_v27  ;;  %v2218_v3 = vmul.f32 1.0614054, %v4252_v35  ;;  %v3468_v6 = vpop.eup %3467  ;;  %vm2399_vm12 = vcmp.ge.f32.partialorder %v4227_v28, 0.0 }
 0xe3f   : > { %v2295_v23 = vadd.f32 0.2548296, %v2283_v30  ;;  %v2284_v60 = vmul.f32 %v4212_v11, %v2272_v24  ;;  %v3470_v32 = vpop.eup %3469  ;;  %v2265_v13 = vmul.f32 %v4234_v4, %v2253_v62 }
 0xe40   : > { %v2297_v36 = vadd.f32 0.2548296, %v2285_v12  ;;  %v2286_v45 = vmul.f32 %v4222_v20, %v2274_v5  ;;  %v2230_v24 = vadd.f32 -1.4531521, %v2218_v3  ;;  %v3472_v37 = vpop.eup %3471 }
 0xe41   : > { %v2307_v53 = vmul.f32 %v4200_v63, %v2295_v23  ;;  %v2296_v34 = vadd.f32 0.2548296, %v2284_v60  ;;  %v2263_v63 = vmul.f32 %v4231_v41, %v2251_v55  ;;  %v2240_v23 = vmul.f32 %v4244_v54, %v2228_v1 }
 0xe42   : > { %v2309_v2 = vmul.f32 %v4208_v61, %v2297_v36  ;;  %v2298_v47 = vadd.f32 0.2548296, %v2286_v45  ;;  %v2357_v1 = vmul.f32 1.442695, %v2338_v17  ;;  %v2183_v45 = vadd.f32 1.0, %v2171_v52 }
 0xe43   : > { %v2367_v30 = vmul.f32 %v3460_v21, %v2307_v53  ;;  %v2308_v61 = vmul.f32 %v4212_v11, %v2296_v34  ;;  %v2275_v36 = vadd.f32 -0.28449672, %v2263_v63  ;;  %v2277_v21 = vadd.f32 -0.28449672, %v2265_v13 }
 0xe44   : > { %v2369_v12 = vmul.f32 %v3462_v49, %v2309_v2  ;;  %v2252_v10 = vadd.f32 1.4214138, %v2240_v23  ;;  %v2242_v53 = vmul.f32 %v4252_v35, %v2230_v24  ;;  %v2310_v3 = vmul.f32 %v4222_v20, %v2298_v47 }
 0xe45   : > { %v2379_v27 = vsub.f32 1.0, %v2367_v30  ;;  %v2368_v5 = vmul.f32 %v3466_v0, %v2308_v61  ;;  %v2287_v55 = vmul.f32 %v4231_v41, %v2275_v36  ;;  %v2289_v2 = vmul.f32 %v4234_v4, %v2277_v21  ;;  %v3474_v21 = vpop.eup %3473 }
 0xe46   : > { %v2381_v49 = vsub.f32 1.0, %v2369_v12  ;;  %v2264_v62 = vmul.f32 %v4244_v54, %v2252_v10  ;;  %v2254_v11 = vadd.f32 1.4214138, %v2242_v53  ;;  %v2133_v34 = vmul.f32 0.5, %v4176_v46 }
 0xe47   : > { %v2403_v60 = vsub.f32 0.0, %v2379_v27  ;;  %v2299_v30 = vadd.f32 0.2548296, %v2287_v55  ;;  %v2301_v16 = vadd.f32 0.2548296, %v2289_v2  ;;  %v4275_v63 = vadd.f32 %v4168_v42, %v4136_v38 }
 0xe48   : > { %v2276_v0 = vadd.f32 -0.28449672, %v2264_v62  ;;  %v2405_v17 = vsub.f32 0.0, %v2381_v49  ;;  %v2380_v13 = vsub.f32 1.0, %v2368_v5  ;;  %v2266_v23 = vmul.f32 %v4252_v35, %v2254_v11 }
 0xe49   : > { %v2415_v12 = vsel %vm2391_vm4, %v2379_v27, %v2403_v60  ;;  %v2311_v20 = vmul.f32 %v4231_v41, %v2299_v30  ;;  %v2313_v46 = vmul.f32 %v4234_v4, %v2301_v16  ;;  %3475 = vpow2.f32 %v2357_v1 }
 0xe4a   : > { %v2288_v52 = vmul.f32 %v4244_v54, %v2276_v0  ;;  %v2370_v24 = vmul.f32 %v3468_v6, %v2310_v3  ;;  %3477 = vrcp.f32 %v2183_v45  ;;  %v2427_v38 = vadd.f32 1.0, %v2415_v12 }
 0xe4b   : > { %v2371_v61 = vmul.f32 %v3470_v32, %v2311_v20  ;;  %v2373_v42 = vmul.f32 %v3472_v37, %v2313_v46  ;;  %v2278_v27 = vadd.f32 -0.28449672, %v2266_v23  ;;  %v2417_v47 = vsel %vm2393_vm5, %v2381_v49, %v2405_v17 }
 0xe4c   : > { %v2300_v8 = vadd.f32 0.2548296, %v2288_v52  ;;  %v2404_v41 = vsub.f32 0.0, %v2380_v13  ;;  %v4288_v4 = vmul.f32 0.70710677, %v4275_v63  ;;  %v2327_v37 = vsub.f32 0.0, %v4240_v9 }
 0xe4d   : > { %v2383_v36 = vsub.f32 1.0, %v2371_v61  ;;  %v2385_v6 = vsub.f32 1.0, %v2373_v42  ;;  %v4295_v10 = vadd.f32 %v4171_v31, %v4140_v39  ;;  %v2382_v56 = vsub.f32 1.0, %v2370_v24 }
 0xe4e   : > { %v2312_v32 = vmul.f32 %v4244_v54, %v2300_v8  ;;  %v2290_v60 = vmul.f32 %v4252_v35, %v2278_v27  ;;  %v4299_v49 = vand.u32 2147483647, %v4288_v4  ;;  %v2439_v5 = vmul.f32 %v2427_v38, %v4194_v26 }
 0xe4f   : > { %v2407_v53 = vsub.f32 0.0, %v2383_v36  ;;  %v2429_v55 = vadd.f32 1.0, %v2417_v47  ;;  %v2409_v2 = vsub.f32 0.0, %v2385_v6  ;;  %v2416_v54 = vsel %vm2392_vm6, %v2380_v13, %v2404_v41 }
 0xe50   : > { %v2372_v62 = vmul.f32 %v3474_v21, %v2312_v32  ;;  %v2302_v39 = vadd.f32 0.2548296, %v2290_v60  ;;  %v2173_v31 = vmul.f32 0.3275911, %v4299_v49  ;;  %v4310_v45 = vmul.f32 0.70710677, %v4295_v10 }
 0xe51   : > { %v2419_v11 = vsel %vm2395_vm7, %v2383_v36, %v2407_v53  ;;  %v2421_v3 = vsel %vm2397_vm8, %v2385_v6, %v2409_v2  ;;  %v2406_v26 = vsub.f32 0.0, %v2382_v56  ;;  %v2441_v14 = vmul.f32 %v2429_v55, %v4203_v44 }
 0xe52   : > { %v2431_v1 = vadd.f32 1.0, %v2419_v11  ;;  %v2384_v30 = vsub.f32 1.0, %v2372_v62  ;;  %v2433_v16 = vadd.f32 1.0, %v2421_v3  ;;  %v2314_v0 = vmul.f32 %v4252_v35, %v2302_v39 }
 0xe53   : > { %v2185_v57 = vadd.f32 1.0, %v2173_v31  ;;  %v3476_v12 = vpop.eup %3475  ;;  %v2160_v20 = vand.u32 2147483647, %v4310_v45  ;;  %v2428_v19 = vadd.f32 1.0, %v2416_v54  ;;  %v2132_v61 = vmul.f32 0.5, %v4181_v33 }
 0xe54   : > { %v2443_v17 = vmul.f32 %v2431_v1, %v4220_v18  ;;  %v2408_v13 = vsub.f32 0.0, %v2384_v30  ;;  %v4316_v46 = vpop.eup %3477  ;;  %v2445_v52 = vmul.f32 %v2433_v16, %v2133_v34  ;;  %v2374_v23 = vmul.f32 %v3476_v12, %v2314_v0 }
 0xe55   : > { %3479 = vrcp.f32 %v2185_v57  ;;  %v2172_v38 = vmul.f32 0.3275911, %v2160_v20  ;;  %v2418_v44 = vsel %vm2394_vm10, %v2382_v56, %v2406_v26  ;;  %v4325_v47 = vadd.f32 %v4173_v29, %v4142_v40 }
 0xe56   : > { %v2451_v24 = vpack.c.bf16 %v2443_v17, %v2439_v5  ;;  %v2420_v35 = vsel %vm2396_vm9, %v2384_v30, %v2408_v13  ;;  %v2453_v18 = vpack.c.bf16 %v2445_v52, %v2441_v14  ;;  %v2386_v8 = vsub.f32 1.0, %v2374_v23 }
 0xe57   : > { %v2432_v42 = vadd.f32 1.0, %v2420_v35  ;;  %v2184_v27 = vadd.f32 1.0, %v2172_v38  ;;  %v2219_v34 = vmul.f32 1.0614054, %v4316_v46  ;;  %v2440_v41 = vmul.f32 %v2428_v19, %v4205_v59 }
 0xe58   : > { %v2410_v36 = vsub.f32 0.0, %v2386_v8  ;;  %v2339_v25 = vmul.f32 %v2327_v37, %v4240_v9  ;;  %v2430_v21 = vadd.f32 1.0, %v2418_v44  ;;  %v4332_v58 = vmul.f32 0.70710677, %v4325_v47 }
 0xe59   : > { %v2444_v33 = vmul.f32 %v2432_v42, %v2132_v61  ;;  %3481 = vrcp.f32 %v2184_v27  ;;  %v2231_v56 = vadd.f32 -1.4531521, %v2219_v34  ;;  %v2130_v40 = vmul.f32 0.5, %v4150_v7 }
 0xe5a   : > { %v2422_v6 = vsel %vm2398_vm11, %v2386_v8, %v2410_v36  ;;  %v2134_v29 = vmul.f32 0.5, %v4188_v22  ;;  %v2162_v59 = vand.u32 2147483647, %v4332_v58  ;;  %v2359_v60 = vmul.f32 1.442695, %v2339_v25 }
 0xe5b   : > { %v2452_v32 = vpack.c.bf16 %v2444_v33, %v2440_v41  ;;  %v2434_v53 = vadd.f32 1.0, %v2422_v6  ;;  %v2329_v9 = vsub.f32 0.0, %v4299_v49  ;;  %v2243_v43 = vmul.f32 %v4316_v46, %v2231_v56 }
 0xe5c   : > { %v2442_v37 = vmul.f32 %v2430_v21, %v2130_v40  ;;  %v2174_v55 = vmul.f32 0.3275911, %v2162_v59  ;;  %v2328_v54 = vsub.f32 0.0, %v2160_v20  ;;  %3483 = vpow2.f32 %v2359_v60 }
 0xe5d   : > { %2754 = vmatprep.mubr.bf16.mxu0 %v2452_v32  ;;  %v2446_v5 = vmul.f32 %v2434_v53, %v2134_v29  ;;  %v2255_v62 = vadd.f32 1.4214138, %v2243_v43  ;;  %v2341_v22 = vmul.f32 %v2329_v9, %v4299_v49  ;;  %v2330_v52 = vsub.f32 0.0, %v2162_v59 }
 0xe5e   : > { %2755 = vmatmul.mubr.bf16.vlgmr.msra.gmra.mrb[36].mxu0 %v2451_v24  ;;  %v2186_v11 = vadd.f32 1.0, %v2174_v55  ;;  %v2340_v26 = vmul.f32 %v2328_v54, %v2160_v20  ;;  %vm2400_vm13 = vcmp.ge.f32.partialorder %v4310_v45, 0.0  ;;  %vm2401_vm14 = vcmp.ge.f32.partialorder %v4288_v4, 0.0 }
 0xe5f   : > { %v3480_v2 = vpop.eup %3479  ;;  %v2454_v7 = vpack.c.bf16 %v2446_v5, %v2442_v37  ;;  %v2267_v31 = vmul.f32 %v4316_v46, %v2255_v62  ;;  %v2363_v0 = vmul.f32 1.442695, %v2341_v22  ;;  %v2342_v20 = vmul.f32 %v2330_v52, %v2162_v59 }
 0xe60   : > { %v2221_v39 = vmul.f32 1.0614054, %v3480_v2  ;;  %3485 = vrcp.f32 %v2186_v11  ;;  %v2361_v19 = vmul.f32 1.442695, %v2340_v26  ;;  %v2135_v22 = vmul.f32 0.5, %v4216_v15 }
 0xe61   : > { %2802 = vmatprep.mubr.bf16.mxu1 %v2454_v7  ;;  %v2279_v3 = vadd.f32 -0.28449672, %v2267_v31  ;;  %3487 = vpow2.f32 %v2363_v0  ;;  %v2365_v36 = vmul.f32 1.442695, %v2342_v20  ;;  %vm2402_vm15 = vcmp.ge.f32.partialorder %v4332_v58, 0.0 }
 0xe62   : > { %v2233_v1 = vadd.f32 -1.4531521, %v2221_v39  ;;  %2803 = vmatmul.mubr.bf16.vlgmr.msra.gmra.mrb[40].mxu1 %v2453_v18  ;;  %3489 = vpow2.f32 %v2361_v19  ;;  %v2137_v15 = vmul.f32 0.5, %v4275_v63  ;;  %v2979_v58 = vld [vmem:[%s4377_s12] ss:$0 sm:$0xff] }
 0xe63   : > { %v3482_v30 = vpop.eup %3481  ;;  %v2291_v12 = vmul.f32 %v4316_v46, %v2279_v3  ;;  %3491 = vpow2.f32 %v2365_v36 }
 0xe64   : > { %v2245_v16 = vmul.f32 %v3480_v2, %v2233_v1  ;;  %v2220_v57 = vmul.f32 1.0614054, %v3482_v30 }
 0xe65   : > { %v2303_v13 = vadd.f32 0.2548296, %v2291_v12 }
 0xe66   : > { %v2257_v14 = vadd.f32 1.4214138, %v2245_v16  ;;  %v2232_v17 = vadd.f32 -1.4531521, %v2220_v57  ;;  %v3484_v35 = vpop.eup %3483 }
 0xe67   : > { %v2315_v24 = vmul.f32 %v4316_v46, %v2303_v13 }
 0xe68   : > { %v2269_v49 = vmul.f32 %v3480_v2, %v2257_v14  ;;  %v2244_v23 = vmul.f32 %v3482_v30, %v2232_v17 }
 0xe69   : > { %v2375_v18 = vmul.f32 %v3484_v35, %v2315_v24 }
 0xe6a   : > { %v2281_v61 = vadd.f32 -0.28449672, %v2269_v49  ;;  %v2256_v38 = vadd.f32 1.4214138, %v2244_v23  ;;  %v3486_v44 = vpop.eup %3485 }
 0xe6b   : > { %v2222_v27 = vmul.f32 1.0614054, %v3486_v44  ;;  %v2387_v25 = vsub.f32 1.0, %v2375_v18  ;;  %v3488_v56 = vpop.eup %3487 }
 0xe6c   : > { %v2293_v42 = vmul.f32 %v3480_v2, %v2281_v61  ;;  %v2268_v8 = vmul.f32 %v3482_v30, %v2256_v38  ;;  %v3490_v9 = vpop.eup %3489 }
 0xe6d   : > { %v2234_v33 = vadd.f32 -1.4531521, %v2222_v27  ;;  %v2411_v29 = vsub.f32 0.0, %v2387_v25  ;;  %v3492_v3 = vpop.eup %3491 }
 0xe6e   : > { %v2305_v34 = vadd.f32 0.2548296, %v2293_v42  ;;  %v2280_v41 = vadd.f32 -0.28449672, %v2268_v8 }
 0xe6f   : > { %v2246_v32 = vmul.f32 %v3486_v44, %v2234_v33  ;;  %v2423_v5 = vsel %vm2399_vm12, %v2387_v25, %v2411_v29 }
 0xe70   : > { %v2317_v21 = vmul.f32 %v3480_v2, %v2305_v34  ;;  %v2292_v6 = vmul.f32 %v3482_v30, %v2280_v41  ;;  %v2435_v7 = vadd.f32 1.0, %v2423_v5 }
 0xe71   : > { %v2258_v40 = vadd.f32 1.4214138, %v2246_v32 }
 0xe72   : > { %v2304_v46 = vadd.f32 0.2548296, %v2292_v6  ;;  %v2377_v53 = vmul.f32 %v3488_v56, %v2317_v21  ;;  %v2447_v16 = vmul.f32 %v2435_v7, %v2135_v22 }
 0xe73   : > { %v2270_v59 = vmul.f32 %v3486_v44, %v2258_v40 }
 0xe74   : > { %v2316_v60 = vmul.f32 %v3482_v30, %v2304_v46  ;;  %v2389_v55 = vsub.f32 1.0, %v2377_v53  ;;  %v2136_v30 = vmul.f32 0.5, %v4295_v10  ;;  %v2455_v13 = vpack.c.bf16 %v2447_v16, %v2447_v16 }
 0xe75   : > { %v2282_v37 = vadd.f32 -0.28449672, %v2270_v59  ;;  %v2138_v10 = vmul.f32 0.5, %v4325_v47 }
 0xe76   : > { %v2376_v43 = vmul.f32 %v3490_v9, %v2316_v60  ;;  %v2413_v39 = vsub.f32 0.0, %v2389_v55 }
 0xe77   : > { %v2294_v54 = vmul.f32 %v3486_v44, %v2282_v37 }
 0xe78   : > { %v2388_v62 = vsub.f32 1.0, %v2376_v43  ;;  %v2425_v57 = vsel %vm2401_vm14, %v2389_v55, %v2413_v39 }
 0xe79   : > { %v2306_v11 = vadd.f32 0.2548296, %v2294_v54  ;;  %v2437_v45 = vadd.f32 1.0, %v2425_v57 }
 0xe7a   : > { %v2412_v2 = vsub.f32 0.0, %v2388_v62 }
 0xe7b   : > { %v2318_v1 = vmul.f32 %v3486_v44, %v2306_v11  ;;  %v2449_v4 = vmul.f32 %v2437_v45, %v2137_v15 }
 0xe7c   : > { %v2424_v31 = vsel %vm2400_vm13, %v2388_v62, %v2412_v2 }
 0xe7d   : > { %v2436_v28 = vadd.f32 1.0, %v2424_v31  ;;  %v2378_v26 = vmul.f32 %v3492_v3, %v2318_v1  ;;  %v2457_v24 = vpack.c.bf16 %v2449_v4, %v2449_v4 }
 0xe7f   : > { %v2448_v0 = vmul.f32 %v2436_v28, %v2136_v30  ;;  %v2390_v12 = vsub.f32 1.0, %v2378_v26 }
 0xe81   : > { %v2456_v14 = vpack.c.bf16 %v2448_v0, %v2448_v0  ;;  %v2414_v17 = vsub.f32 0.0, %v2390_v12 }
 0xe83   : > { %2762 = vmatprep.mubr.bf16.mxu0 %v2456_v14  ;;  %v2426_v19 = vsel %vm2402_vm15, %v2390_v12, %v2414_v17 }
 0xe84   : > { %2763 = vmatmul.mubr.bf16.gmra.mrb[40].mxu0 %v2455_v13  ;;  %v2438_v52 = vadd.f32 1.0, %v2426_v19 }
 0xe86   : > { %v2450_v49 = vmul.f32 %v2438_v52, %v2138_v10 }
 0xe88   : > { %v2458_v23 = vpack.c.bf16 %v2450_v49, %v2450_v49 }
 0xe8a   : > { %2810 = vmatprep.mubr.bf16.mxu1 %v2458_v23 }
 0xe8b   : > { %2811 = vmatmul.mubr.bf16.gmra.mrb[44].mxu1 %v2457_v24 }
 0xf31   : > { %v3088_v61 = vpop.f32.mrb[36].mxu0 }
 0xf32   : > { %v3089_v35 = vpop.f32.mrb[37].mxu0 }
 0xf33   : > { %v3090_v38 = vadd.f32 %v3089_v35, %v3088_v61  ;;  %v3091_v63 = vpop.f32.mrb[38].mxu0 }
 0xf34   : > { %v3092_v44 = vpop.f32.mrb[39].mxu0 }
 0xf35   : > { %v3093_v20 = vadd.f32 %v3092_v44, %v3091_v63  ;;  %v3116_v18 = vpop.f32.mrb[40].mxu1  ;;  %v2757_v47 = vadd.f32 %v3090_v38, %v2979_v58 }
 0xf36   : > { %v3117_v42 = vpop.f32.mrb[41].mxu1 }
 0xf37   : > { %v3118_v8 = vadd.f32 %v3117_v42, %v3116_v18  ;;  %v3119_v27 = vpop.f32.mrb[42].mxu1  ;;  %v2760_v34 = vadd.f32 %v3093_v20, %v2979_v58 }
 0xf38   : > { %v3120_v41 = vpop.f32.mrb[43].mxu1 }
 0xf39   : > { %v2805_v33 = vadd.f32 %v3118_v8, %v2757_v47  ;;  %v3121_v36 = vadd.f32 %v3120_v41, %v3119_v27 }
 0xf3b   : > { %v2818_v25 = vadd.f32 %v2805_v33, %v3897_v48  ;;  %v2808_v21 = vadd.f32 %v3121_v36, %v2760_v34 }
 0xf3d   : > { %2821 = vst [vmem:[%s440_s22] sm:$0xff] %v2818_v25  ;;  %v2819_v6 = vadd.f32 %v2808_v21, %v3900_v50 }
 0xf3f   : > { %2822 = vst [vmem:[%s440_s22 + $0x8] sm:$0xff] %v2819_v6 }
 0xf57   : > { %v3094_v32 = vpop.f32.mrb[40].mxu0 }
 0xf58   : > { %v3095_v56 = vpop.f32.mrb[41].mxu0 }
 0xf59   : > { %v3096_v46 = vadd.f32 %v3095_v56, %v3094_v32  ;;  %v3097_v40 = vpop.f32.mrb[42].mxu0 }
 0xf5a   : > { %v3098_v29 = vpop.f32.mrb[43].mxu0 }
 0xf5b   : > { %v2765_v60 = vadd.f32 %v3096_v46, %v2979_v58 }
 0xf5e   : > { %v3122_v53 = vpop.f32.mrb[44].mxu1 }
 0xf5f   : > { %v3123_v59 = vpop.f32.mrb[45].mxu1 }
 0xf60   : > { %v3124_v9 = vadd.f32 %v3123_v59, %v3122_v53  ;;  %v3125_v43 = vpop.f32.mrb[46].mxu1 }
 0xf61   : > { %v3126_v37 = vpop.f32.mrb[47].mxu1 }
 0xf62   : > { %v2813_v5 = vadd.f32 %v3124_v9, %v2765_v60 }
 0xf64   : > { %v2820_v55 = vadd.f32 %v2813_v5, %v3902_v51 }
 0xf66   : > { %2823 = vst [vmem:[%s440_s22 + $0x10] sm:$0x1] %v2820_v55 }
 0xf67 PF: > { %s23_s25 = sadd.s32 1, %s3502_s25  }
 0xf68   : > { %p20_p4 = scmp.ge.s32.totalorder %s23_s25, 4  }
 0xf6a   :  { %22 = sbr.rel (!%p20_p4) target bundleno = 1 (0x1), region = 102 }

</bundles_post_ra>
